<compile_context>
chip_gen: v7x
topology: tpu7x:2x2x1
jax: 0.10.0
libtpu: 0.0.40
codegen_flags: <defaults>
</compile_context>

<pallas_src>
import math

import jax
import jax.numpy as jnp
import numpy as np
from jax.experimental import pallas as pl
from jax.experimental.pallas import tpu as pltpu

TWO_PI = float(2.0 * math.pi)        # Python floats -> baked-in constants, not captured tracers
INV_TWO_PI = float(1.0 / (2.0 * math.pi))


def gpt_kernel(x_ref, sW_ref, sb_ref, w1_ref, b1_ref, w2_ref, b2_ref,
               w3_ref, bias_ref, o_ref):
    """One row-tile of the stacked TGPT forward pass.

    x_ref   : (TM, 2)     tile of collocation points (x, t)
    sW_ref  : (2, 2N)     stacked shift weights (W^T), columns interleaved per neuron
    sb_ref  : (1, 2N)     stacked shift biases
    w1_ref  : (2N, NH)    block-diagonal P layer-1 weights (W^T)
    b1_ref  : (1, NH)
    w2_ref  : (NH, NH)    block-diagonal P layer-2 weights (W^T)
    b2_ref  : (1, NH)
    w3_ref  : (NH, 1)     per-neuron w3 pre-scaled by c_initial
    bias_ref: (1, 1)      sum_i c_i * b3_i
    o_ref   : (TM, 1)
    """
    x = x_ref[...]                                          # (TM, 2) f32

    # shift = x @ sW_cat + sb_cat, done as two VPU broadcast mul-adds (K=2 is far
    # too small to be worth an MXU pass).
    shift = (x[:, 0:1] * sW_ref[0:1, :]
             + x[:, 1:2] * sW_ref[1:2, :]
             + sb_ref[...])                                 # (TM, 2N)

    # `% 2*pi` only on the even lanes (the per-neuron "x" columns).
    lane = jax.lax.broadcasted_iota(jnp.int32, shift.shape, 1)
    wrapped = shift - jnp.floor(shift * INV_TWO_PI) * TWO_PI
    z = jnp.where((lane % 2) == 0, wrapped, shift)          # (TM, 2N)

    # Block-diagonal tanh MLP: every neuron's P_i evaluated in one lane-dense pass.
    h = jnp.tanh(jnp.dot(z, w1_ref[...],
                         preferred_element_type=jnp.float32) + b1_ref[...])   # (TM, NH)
    h = jnp.tanh(jnp.dot(h, w2_ref[...],
                         preferred_element_type=jnp.float32) + b2_ref[...])   # (TM, NH)

    # Final projection with c_initial and b3 already folded in.
    o_ref[...] = (jnp.dot(h, w3_ref[...],
                          preferred_element_type=jnp.float32) + bias_ref[...])  # (TM, 1)


def _block_diag(blocks):
    """(N, r, c) stacked blocks -> (N*r, N*c) block-diagonal matrix."""
    n, r, c = blocks.shape
    out = jnp.zeros((n * r, n * c), blocks.dtype)
    for i in range(n):
        out = out.at[i * r:(i + 1) * r, i * c:(i + 1) * c].set(blocks[i])
    return out


def pack_params(p):
    """Stack per-neuron parameters into lane-dense / block-diagonal form."""
    n, _, h = p["w1"].shape
    sW_cat = jnp.concatenate([p["sW"][i] for i in range(n)], axis=1)   # (2, 2N)
    sb_cat = p["sb"].reshape(1, 2 * n)                                 # (1, 2N)
    w1_bd = _block_diag(p["w1"])                                       # (2N, N*H)
    b1_cat = p["b1"].reshape(1, n * h)                                 # (1, N*H)
    w2_bd = _block_diag(p["w2"])                                       # (N*H, N*H)
    b2_cat = p["b2"].reshape(1, n * h)                                 # (1, N*H)
    c_vec = p["c"][0]                                                  # (N,)
    w3_folded = (p["w3"] * c_vec[:, None, None]).reshape(n * h, 1)     # (N*H, 1)
    bias_folded = jnp.sum(p["b3"][:, 0] * c_vec).reshape(1, 1)         # (1, 1)
    return (sW_cat, sb_cat, w1_bd, b1_cat, w2_bd, b2_cat, w3_folded, bias_folded)


def gpt_forward(x, params, *, tile_m=512):
    M, D = x.shape
    assert D == 2
    tile_m = min(tile_m, M)
    assert M % tile_m == 0, "pad the collocation points to a multiple of tile_m"

    packed = pack_params(params)

    def full_spec(a):
        return pl.BlockSpec(a.shape, lambda m: (0, 0))

    return pl.pallas_call(
        gpt_kernel,
        out_shape=jax.ShapeDtypeStruct((M, 1), jnp.float32),
        grid=(M // tile_m,),
        in_specs=[pl.BlockSpec((tile_m, 2), lambda m: (m, 0))]
                 + [full_spec(a) for a in packed],
        out_specs=pl.BlockSpec((tile_m, 1), lambda m: (m, 0)),
        compiler_params=pltpu.CompilerParams(
            dimension_semantics=("parallel",)),
    )(x, *packed)


def gpt_forward_ref(x, p):
    """Pure-JAX reference mirroring the PyTorch forward (per-neuron loop)."""
    n = p["sW"].shape[0]
    us = []
    for i in range(n):
        shift = x @ p["sW"][i] + p["sb"][i]
        xs = jnp.mod(shift[:, :1], TWO_PI)
        ts = shift[:, 1:]
        z = jnp.concatenate([xs, ts], axis=1)
        h = jnp.tanh(z @ p["w1"][i] + p["b1"][i])
        h = jnp.tanh(h @ p["w2"][i] + p["b2"][i])
        us.append(h @ p["w3"][i] + p["b3"][i])
    u = jnp.concatenate(us, axis=1)                  # (M, N)
    return u @ p["c"].T                              # (M, 1)


def make_params(key, *, num_neurons=4, hidden=32):
    """Deterministic synthetic parameters (shapes follow the module's __init__)."""
    N, H = num_neurons, hidden
    ks = jax.random.split(key, 8)
    # Shift linears: identity weight, zero bias — exactly as the module's __init__.
    sW = jnp.tile(jnp.eye(2, dtype=jnp.float32)[None], (N, 1, 1))   # stored as W^T == I
    sb = jnp.zeros((N, 2), jnp.float32)
    # Pretrained activation networks P_i (synthetic, deterministic), stored as W^T.
    w1 = 0.5 * jax.random.normal(ks[0], (N, 2, H), jnp.float32)
    b1 = 0.1 * jax.random.normal(ks[1], (N, H), jnp.float32)
    w2 = (1.0 / jnp.sqrt(H)) * jax.random.normal(ks[2], (N, H, H), jnp.float32)
    b2 = 0.1 * jax.random.normal(ks[3], (N, H), jnp.float32)
    w3 = (1.0 / jnp.sqrt(H)) * jax.random.normal(ks[4], (N, H, 1), jnp.float32)
    b3 = 0.1 * jax.random.normal(ks[5], (N, 1), jnp.float32)
    # c_initial: (out_dim=1, num_neurons)
    c = 0.5 * jax.random.normal(ks[6], (1, N), jnp.float32)
    return dict(sW=sW, sb=sb, w1=w1, b1=b1, w2=w2, b2=b2, w3=w3, b3=b3, c=c)


# TODO(synk): lossR/lossIC/lossBC need autograd through the forward; only forward() is
# implemented as a kernel here.

if __name__ == "__main__":
    key = jax.random.PRNGKey(0)
    k_x, k_t, k_p = jax.random.split(key, 3)

    M, N, H = 1024, 4, 32                 # grid = M/tile_m = 2 (even, >=2 for v7x)
    # Collocation points: x in [0, 4*pi) so the modulo matters, t in [0, 1).
    xs = jax.random.uniform(k_x, (M, 1), jnp.float32, 0.0, 4.0 * math.pi)
    ts = jax.random.uniform(k_t, (M, 1), jnp.float32, 0.0, 1.0)
    x_data = jnp.concatenate([xs, ts], axis=1)       # (M, 2) float32

    params = make_params(k_p, num_neurons=N, hidden=H)

    out = gpt_forward(x_data, params, tile_m=512)
    out = jax.block_until_ready(out)

    ref = jax.block_until_ready(gpt_forward_ref(x_data, params))
    np.testing.assert_allclose(np.asarray(out), np.asarray(ref),
                               rtol=1e-3, atol=1e-3)
    assert out.shape == (M, 1) and out.dtype == jnp.float32

    print("KERNEL_OK")
</pallas_src>

<mosaic_0001>
module attributes {stable_mosaic.version = 11 : i64} {
  func.func @gpt_kernel(%arg0: i32, %arg1: memref<512x2xf32, #tpu.memory_space<vmem>>, %arg2: memref<2x8xf32, #tpu.memory_space<vmem>>, %arg3: memref<1x8xf32, #tpu.memory_space<vmem>>, %arg4: memref<8x128xf32, #tpu.memory_space<vmem>>, %arg5: memref<1x128xf32, #tpu.memory_space<vmem>>, %arg6: memref<128x128xf32, #tpu.memory_space<vmem>>, %arg7: memref<1x128xf32, #tpu.memory_space<vmem>>, %arg8: memref<128x1xf32, #tpu.memory_space<vmem>>, %arg9: memref<1x1xf32, #tpu.memory_space<vmem>>, %arg10: memref<512x1xf32, #tpu.memory_space<vmem>>) attributes {dimension_semantics = [#tpu.dimension_semantics<parallel>], iteration_bounds = array<i64: 2>, scalar_prefetch = 0 : i64, scratch_operands = 0 : i64, tpu.core_type = #tpu.core_type<tc>, window_params = [{transform_indices = @transform_0, window_bounds = array<i64: 512, 2>}, {pipeline_mode = #tpu.pipeline_mode<synchronous>, transform_indices = @transform_1, window_bounds = array<i64: 2, 8>}, {pipeline_mode = #tpu.pipeline_mode<synchronous>, transform_indices = @transform_2, window_bounds = array<i64: 1, 8>}, {pipeline_mode = #tpu.pipeline_mode<synchronous>, transform_indices = @transform_3, window_bounds = array<i64: 8, 128>}, {pipeline_mode = #tpu.pipeline_mode<synchronous>, transform_indices = @transform_4, window_bounds = array<i64: 1, 128>}, {pipeline_mode = #tpu.pipeline_mode<synchronous>, transform_indices = @transform_5, window_bounds = array<i64: 128, 128>}, {pipeline_mode = #tpu.pipeline_mode<synchronous>, transform_indices = @transform_6, window_bounds = array<i64: 1, 128>}, {pipeline_mode = #tpu.pipeline_mode<synchronous>, transform_indices = @transform_7, window_bounds = array<i64: 128, 1>}, {pipeline_mode = #tpu.pipeline_mode<synchronous>, transform_indices = @transform_8, window_bounds = array<i64: 1, 1>}, {transform_indices = @transform_9, window_bounds = array<i64: 512, 1>}]} {
    %c0 = arith.constant 0 : index
    %c0_0 = arith.constant 0 : index
    %0 = vector.load %arg1[%c0, %c0_0] : memref<512x2xf32, #tpu.memory_space<vmem>>, vector<512x2xf32>
    %1 = vector.extract_strided_slice %0 {offsets = [0, 0], sizes = [512, 1], strides = [1, 1]} : vector<512x2xf32> to vector<512x1xf32>
    %c0_1 = arith.constant 0 : index
    %c0_2 = arith.constant 0 : index
    %2 = vector.load %arg2[%c0_1, %c0_2] : memref<2x8xf32, #tpu.memory_space<vmem>>, vector<1x8xf32>
    %3 = vector.broadcast %1 : vector<512x1xf32> to vector<512x8xf32>
    %4 = vector.broadcast %2 : vector<1x8xf32> to vector<512x8xf32>
    %5 = arith.mulf %3, %4 : vector<512x8xf32>
    %6 = vector.extract_strided_slice %0 {offsets = [0, 1], sizes = [512, 1], strides = [1, 1]} : vector<512x2xf32> to vector<512x1xf32>
    %c1 = arith.constant 1 : index
    %c0_3 = arith.constant 0 : index
    %7 = vector.load %arg2[%c1, %c0_3] : memref<2x8xf32, #tpu.memory_space<vmem>>, vector<1x8xf32>
    %8 = vector.broadcast %6 : vector<512x1xf32> to vector<512x8xf32>
    %9 = vector.broadcast %7 : vector<1x8xf32> to vector<512x8xf32>
    %10 = arith.mulf %8, %9 : vector<512x8xf32>
    %11 = arith.addf %5, %10 : vector<512x8xf32>
    %c0_4 = arith.constant 0 : index
    %c0_5 = arith.constant 0 : index
    %12 = vector.load %arg3[%c0_4, %c0_5] : memref<1x8xf32, #tpu.memory_space<vmem>>, vector<1x8xf32>
    %13 = vector.broadcast %12 : vector<1x8xf32> to vector<512x8xf32>
    %14 = arith.addf %11, %13 : vector<512x8xf32>
    %15 = tpu.iota {dimensions = array<i32: 1>} : vector<512x8xi32>
    %cst = arith.constant 0.159154937 : f32
    %16 = vector.broadcast %cst : f32 to vector<512x8xf32>
    %17 = arith.mulf %14, %16 : vector<512x8xf32>
    %18 = math.floor %17 : vector<512x8xf32>
    %cst_6 = arith.constant 6.28318548 : f32
    %19 = vector.broadcast %cst_6 : f32 to vector<512x8xf32>
    %20 = arith.mulf %18, %19 : vector<512x8xf32>
    %21 = arith.subf %14, %20 : vector<512x8xf32>
    %c2_i32 = arith.constant 2 : i32
    %c0_i32 = arith.constant 0 : i32
    %22 = arith.cmpi eq, %c2_i32, %c0_i32 : i32
    %c1_i32 = arith.constant 1 : i32
    %23 = arith.select %22, %c1_i32, %c2_i32 : i32
    %24 = vector.broadcast %23 : i32 to vector<512x8xi32>
    %25 = arith.remsi %15, %24 : vector<512x8xi32>
    %c0_i32_7 = arith.constant 0 : i32
    %26 = vector.broadcast %c0_i32_7 : i32 to vector<512x8xi32>
    %27 = arith.cmpi ne, %25, %26 : vector<512x8xi32>
    %c0_i32_8 = arith.constant 0 : i32
    %28 = vector.broadcast %c0_i32_8 : i32 to vector<512x8xi32>
    %29 = arith.cmpi slt, %25, %28 : vector<512x8xi32>
    %c0_i32_9 = arith.constant 0 : i32
    %30 = arith.cmpi slt, %23, %c0_i32_9 : i32
    %31 = vector.broadcast %30 : i1 to vector<512x8xi1>
    %32 = vector.broadcast %31 : vector<512x8xi1> to vector<512x8xi1>
    %33 = arith.xori %29, %32 : vector<512x8xi1>
    %34 = arith.andi %33, %27 : vector<512x8xi1>
    %35 = vector.broadcast %23 : i32 to vector<512x8xi32>
    %36 = arith.addi %25, %35 : vector<512x8xi32>
    %37 = arith.select %34, %36, %25 : vector<512x8xi1>, vector<512x8xi32>
    %c0_i32_10 = arith.constant 0 : i32
    %38 = vector.broadcast %c0_i32_10 : i32 to vector<512x8xi32>
    %39 = arith.cmpi eq, %37, %38 : vector<512x8xi32>
    %40 = arith.select %39, %21, %14 : vector<512x8xi1>, vector<512x8xf32>
    %c0_11 = arith.constant 0 : index
    %c0_12 = arith.constant 0 : index
    %41 = vector.load %arg4[%c0_11, %c0_12] : memref<8x128xf32, #tpu.memory_space<vmem>>, vector<8x128xf32>
    %cst_13 = arith.constant dense<0.000000e+00> : vector<512x128xf32>
    %42 = tpu.matmul %40, %41, %cst_13 {dimension_numbers = #tpu.dot_dimension_numbers<[1], [0], [0], [1], [0, 0, 1, 1], [], []>} : vector<512x8xf32>, vector<8x128xf32>, vector<512x128xf32> -> vector<512x128xf32>
    %c0_14 = arith.constant 0 : index
    %c0_15 = arith.constant 0 : index
    %43 = vector.load %arg5[%c0_14, %c0_15] : memref<1x128xf32, #tpu.memory_space<vmem>>, vector<1x128xf32>
    %44 = vector.broadcast %43 : vector<1x128xf32> to vector<512x128xf32>
    %45 = arith.addf %42, %44 : vector<512x128xf32>
    %46 = math.tanh %45 : vector<512x128xf32>
    %c0_16 = arith.constant 0 : index
    %c0_17 = arith.constant 0 : index
    %47 = vector.load %arg6[%c0_16, %c0_17] : memref<128x128xf32, #tpu.memory_space<vmem>>, vector<128x128xf32>
    %cst_18 = arith.constant dense<0.000000e+00> : vector<512x128xf32>
    %48 = tpu.matmul %46, %47, %cst_18 {dimension_numbers = #tpu.dot_dimension_numbers<[1], [0], [0], [1], [0, 0, 1, 1], [], []>} : vector<512x128xf32>, vector<128x128xf32>, vector<512x128xf32> -> vector<512x128xf32>
    %c0_19 = arith.constant 0 : index
    %c0_20 = arith.constant 0 : index
    %49 = vector.load %arg7[%c0_19, %c0_20] : memref<1x128xf32, #tpu.memory_space<vmem>>, vector<1x128xf32>
    %50 = vector.broadcast %49 : vector<1x128xf32> to vector<512x128xf32>
    %51 = arith.addf %48, %50 : vector<512x128xf32>
    %52 = math.tanh %51 : vector<512x128xf32>
    %c0_21 = arith.constant 0 : index
    %c0_22 = arith.constant 0 : index
    %53 = vector.load %arg8[%c0_21, %c0_22] : memref<128x1xf32, #tpu.memory_space<vmem>>, vector<128x1xf32>
    %cst_23 = arith.constant dense<0.000000e+00> : vector<512x1xf32>
    %54 = tpu.matmul %52, %53, %cst_23 {dimension_numbers = #tpu.dot_dimension_numbers<[1], [0], [0], [1], [0, 0, 1, 1], [], []>} : vector<512x128xf32>, vector<128x1xf32>, vector<512x1xf32> -> vector<512x1xf32>
    %c0_24 = arith.constant 0 : index
    %c0_25 = arith.constant 0 : index
    %55 = vector.load %arg9[%c0_24, %c0_25] : memref<1x1xf32, #tpu.memory_space<vmem>>, vector<1x1xf32>
    %56 = vector.broadcast %55 : vector<1x1xf32> to vector<512x1xf32>
    %57 = arith.addf %54, %56 : vector<512x1xf32>
    %c0_26 = arith.constant 0 : index
    %c0_27 = arith.constant 0 : index
    %58 = vector.load %arg10[%c0_26, %c0_27] : memref<512x1xf32, #tpu.memory_space<vmem>>, vector<512x1xf32>
    tpu.vector_store %arg10[%c0_26, %c0_27], %57 {strides = array<i32>} : memref<512x1xf32, #tpu.memory_space<vmem>>, vector<512x1xf32>,
    return
  }
  func.func @transform_0(%arg0: i32) -> (i32, i32) {
    %c0_i32 = arith.constant 0 : i32
    %c0_i32_0 = arith.constant 0 : i32
    return %arg0, %c0_i32 : i32, i32
  }
  func.func @transform_1(%arg0: i32) -> (i32, i32) {
    %c0_i32 = arith.constant 0 : i32
    %c0_i32_0 = arith.constant 0 : i32
    %c0_i32_1 = arith.constant 0 : i32
    return %c0_i32, %c0_i32_0 : i32, i32
  }
  func.func @transform_2(%arg0: i32) -> (i32, i32) {
    %c0_i32 = arith.constant 0 : i32
    %c0_i32_0 = arith.constant 0 : i32
    %c0_i32_1 = arith.constant 0 : i32
    return %c0_i32, %c0_i32_0 : i32, i32
  }
  func.func @transform_3(%arg0: i32) -> (i32, i32) {
    %c0_i32 = arith.constant 0 : i32
    %c0_i32_0 = arith.constant 0 : i32
    %c0_i32_1 = arith.constant 0 : i32
    return %c0_i32, %c0_i32_0 : i32, i32
  }
  func.func @transform_4(%arg0: i32) -> (i32, i32) {
    %c0_i32 = arith.constant 0 : i32
    %c0_i32_0 = arith.constant 0 : i32
    %c0_i32_1 = arith.constant 0 : i32
    return %c0_i32, %c0_i32_0 : i32, i32
  }
  func.func @transform_5(%arg0: i32) -> (i32, i32) {
    %c0_i32 = arith.constant 0 : i32
    %c0_i32_0 = arith.constant 0 : i32
    %c0_i32_1 = arith.constant 0 : i32
    return %c0_i32, %c0_i32_0 : i32, i32
  }
  func.func @transform_6(%arg0: i32) -> (i32, i32) {
    %c0_i32 = arith.constant 0 : i32
    %c0_i32_0 = arith.constant 0 : i32
    %c0_i32_1 = arith.constant 0 : i32
    return %c0_i32, %c0_i32_0 : i32, i32
  }
  func.func @transform_7(%arg0: i32) -> (i32, i32) {
    %c0_i32 = arith.constant 0 : i32
    %c0_i32_0 = arith.constant 0 : i32
    %c0_i32_1 = arith.constant 0 : i32
    return %c0_i32, %c0_i32_0 : i32, i32
  }
  func.func @transform_8(%arg0: i32) -> (i32, i32) {
    %c0_i32 = arith.constant 0 : i32
    %c0_i32_0 = arith.constant 0 : i32
    %c0_i32_1 = arith.constant 0 : i32
    return %c0_i32, %c0_i32_0 : i32, i32
  }
  func.func @transform_9(%arg0: i32) -> (i32, i32) {
    %c0_i32 = arith.constant 0 : i32
    %c0_i32_0 = arith.constant 0 : i32
    return %arg0, %c0_i32 : i32, i32
  }
}

</mosaic_0001>

<bundles_post_ra>
// kernel: tpu_custom_call.1
= control target key start
LH: loop header
LB: loop body
LE: loop exit
PB: predicated region body
PF: predicated region fallthrough
CT: control target
= control target key end

     0   :  { %s4300_s11 = smov 0   ;;  %s5254_s0 = inlined_call_operand.vmem [shape: f32[1024,2], index: 0, kind: input, shape index: {}]   ;;  %s5255_s1 = inlined_call_operand.vmem [shape: f32[2,8], index: 1, kind: input, shape index: {}]   ;;  %s5256_s2 = inlined_call_operand.vmem [shape: f32[1,8], index: 2, kind: input, shape index: {}]   ;;  %s5257_s3 = inlined_call_operand.vmem [shape: f32[8,128], index: 3, kind: input, shape index: {}]   ;;  %s5258_s4 = inlined_call_operand.vmem [shape: f32[1,128], index: 4, kind: input, shape index: {}]   ;;  %s5259_s5 = inlined_call_operand.vmem [shape: f32[128,128], index: 5, kind: input, shape index: {}]   ;;  %s5260_s6 = inlined_call_operand.vmem [shape: f32[1,128], index: 6, kind: input, shape index: {}]   ;;  %s5261_s7 = inlined_call_operand.vmem [shape: f32[128,1], index: 7, kind: input, shape index: {}]   ;;  %s5262_s8 = inlined_call_operand.<no memory space> [shape: f32[1,1], index: 8, kind: input, shape index: {}]   ;;  %s5263_s9 = inlined_call_operand.vmem [shape: f32[1024,1], index: 9, kind: output, shape index: {}]  }
   0x1   :  { %v14_v0 = vstv %s5262_s8 }
   0x2   :  { %15 = vst [vmem:[#allocation2] sm:$0x1] %v14_v0 }
   0x3 LB: > { %s3237_s12 = sadd.s32 4294967295, %s4243_s11   ;;  %p3241_p0 = scmp.ge.s32.totalorder %s4243_s11, 1  ;;  %s4243_s11 = sphi %s4300_s11, %s21_s11  }
   0x4   : > { %p290_p1 = scmp.lt.s32.totalorder %s4243_s11, 3 }
   0x6   : > { %p291_p2 = pnand %p3241_p0, %p290_p1 }
   0x7   : > { %s3242_s13 = sshll.u32 (!%p291_p2), %s3237_s12, 6  ;;  %v4245_v1 = vmov (!%p291_p2), 0   ;;  %v4246_v4 = vmov (!%p291_p2), 1   ;;  %v1586_v9 = vld [vmem:[%s5257_s3] sm:$0xff] (!%p291_p2)  ;;  %v1251_v44 = vlaneseq (!%p291_p2)  ;;  %vm1594_vm1 = vcmask (!%p291_p2), 64512  }
   0x8   : > { %294 = sbr.rel (%p291_p2) target bundleno = 1086 (0x43e), region = 56  ;;  %3975 = vset.pattern.permute.xlu1 (!%p291_p2), %v4245_v1  ;;  %3973 = vset.pattern.permute.xlu0 (!%p291_p2), %v4245_v1  ;;  %p327_p3 = scmp.lt.s32.totalorder (!%p291_p2), %s3242_s13, 127  ;;  %v4357_v39 = vld [vmem:[%s5255_s1] ss:$0 sm:$0xff] (!%p291_p2)  ;;  %v4362_v40 = vld [vmem:[%s5255_s1 + $0x1] ss:$0 sm:$0xff] (!%p291_p2) }
   0x9   : > { %3543 = vmatprep.subr.mxu0 (!%p291_p2), %v1586_v9  ;;  %3961 = vmatprep.subr.mxu1 (!%p291_p2), %v1586_v9  ;;  %v4372_v49 = vld [vmem:[%s5256_s2] ss:$0 sm:$0xff] (!%p291_p2)  ;;  %v1252_v54 = vand.u32 (!%p291_p2), 127, %v1251_v44  ;;  %vm3116_vm2 = vcmask (!%p291_p2), 7168  }
   0xa   : > { %3544 = vmatpush3.msra.mxu0 (!%p291_p2), %v1586_v9  ;;  %3962 = vmatpush3.msra.mxu1 (!%p291_p2), %v1586_v9 }
   0xf   : > { %s5267_s13 = smov (!%p327_p3, %s3242_s13), 127 }
  0x10   : > { %s3243_s8 = sshll.u32 %s5267_s13, 3 }
  0x11   : > { %s4316_s16 = scalar_lea.vmem %s5254_s0, %s3243_s8  ;;  %s5057_s25 = scalar_lea.vmem %s5263_s9, %s3243_s8 }
  0x12   : > { %v339_v2 = vld [vmem:[%s4316_s16 + $0x8] sm:$0xff]  ;;  %v338_v3 = vld [vmem:[%s4316_s16] sm:$0xff]  ;;  %v340_v5 = vld [vmem:[%s4316_s16 + $0x10] sm:$0xff] }
  0x13   : > { %410 = vperm.xlu1 %3975, %v339_v2   ;;  %405 = vperm.xlu0 %3973, %v338_v3   ;;  %v341_v6 = vld [vmem:[%s4316_s16 + $0x18] sm:$0xff]  ;;  %v342_v7 = vld [vmem:[%s4316_s16 + $0x20] sm:$0xff]  ;;  %v343_v8 = vld [vmem:[%s4316_s16 + $0x28] sm:$0xff] }
  0x14   : > { %v344_v10 = vld [vmem:[%s4316_s16 + $0x30] sm:$0xff]  ;;  %v345_v11 = vld [vmem:[%s4316_s16 + $0x38] sm:$0xff]  ;;  %v346_v12 = vld [vmem:[%s4316_s16 + $0x40] sm:$0xff] }
  0x15   : > { %v347_v13 = vld [vmem:[%s4316_s16 + $0x48] sm:$0xff]  ;;  %v348_v14 = vld [vmem:[%s4316_s16 + $0x50] sm:$0xff]  ;;  %v349_v15 = vld [vmem:[%s4316_s16 + $0x58] sm:$0xff] }
  0x16   : > { %v350_v16 = vld [vmem:[%s4316_s16 + $0x60] sm:$0xff]  ;;  %v351_v17 = vld [vmem:[%s4316_s16 + $0x68] sm:$0xff]  ;;  %v352_v18 = vld [vmem:[%s4316_s16 + $0x70] sm:$0xff] }
  0x17   : > { %3976 = vset.pattern.permute.xlu1 %v4246_v4  ;;  %3974 = vset.pattern.permute.xlu0 %v4246_v4  ;;  %v353_v19 = vld [vmem:[%s4316_s16 + $0x78] sm:$0xff]  ;;  %v354_v20 = vld [vmem:[%s4316_s16 + $0x80] sm:$0xff]  ;;  %v355_v21 = vld [vmem:[%s4316_s16 + $0x88] sm:$0xff] }
  0x18   : > { %797 = vperm.xlu1 %3976, %v339_v2   ;;  %793 = vperm.xlu0 %3974, %v338_v3   ;;  %v356_v22 = vld [vmem:[%s4316_s16 + $0x90] sm:$0xff]  ;;  %v357_v23 = vld [vmem:[%s4316_s16 + $0x98] sm:$0xff]  ;;  %v358_v24 = vld [vmem:[%s4316_s16 + $0xa0] sm:$0xff] }
  0x19   : > { %v359_v25 = vld [vmem:[%s4316_s16 + $0xa8] sm:$0xff]  ;;  %v360_v26 = vld [vmem:[%s4316_s16 + $0xb0] sm:$0xff]  ;;  %v361_v27 = vld [vmem:[%s4316_s16 + $0xb8] sm:$0xff] }
  0x1a   : > { %v362_v28 = vld [vmem:[%s4316_s16 + $0xc0] sm:$0xff]  ;;  %v363_v29 = vld [vmem:[%s4316_s16 + $0xc8] sm:$0xff]  ;;  %v364_v30 = vld [vmem:[%s4316_s16 + $0xd0] sm:$0xff] }
  0x1b   : > { %v365_v31 = vld [vmem:[%s4316_s16 + $0xd8] sm:$0xff]  ;;  %v366_v32 = vld [vmem:[%s4316_s16 + $0xe0] sm:$0xff]  ;;  %v367_v33 = vld [vmem:[%s4316_s16 + $0xe8] sm:$0xff] }
  0x1c   : > { %3977 = vset.pattern.permute.xlu1 %v4245_v1  ;;  %801 = vperm.xlu0 %3974, %v340_v5   ;;  %v368_v34 = vld [vmem:[%s4316_s16 + $0xf0] sm:$0xff]  ;;  %v369_v35 = vld [vmem:[%s4316_s16 + $0xf8] sm:$0xff]  ;;  %v370_v36 = vld [vmem:[%s4316_s16 + $0x100] sm:$0xff]  ;;  %v1513_v1 = vand.u32 1, %v1252_v54 }
  0x1d   : > { %415 = vperm.xlu1 %3977, %v340_v5   ;;  %v371_v41 = vld [vmem:[%s4316_s16 + $0x108] sm:$0xff]  ;;  %v372_v50 = vld [vmem:[%s4316_s16 + $0x110] sm:$0xff]  ;;  %v373_v60 = vld [vmem:[%s4316_s16 + $0x118] sm:$0xff] }
  0x1e   : > { %vm4384_vm0 = vcmp.eq.s32.totalorder %v1513_v1, 0 }
  0x20   : > { %805 = vperm.xlu0 %3974, %v341_v6  }
  0x21   : > { %420 = vperm.xlu1 %3977, %v341_v6  }
  0x24   : > { %809 = vperm.xlu0 %3974, %v342_v7  }
  0x25   : > { %425 = vperm.xlu1 %3977, %v342_v7  }
  0x28   : > { %813 = vperm.xlu0 %3974, %v343_v8  }
  0x29   : > { %430 = vperm.xlu1 %3977, %v343_v8   ;;  %v374_v8 = vld [vmem:[%s4316_s16 + $0x120] sm:$0xff] }
  0x2c   : > { %817 = vperm.xlu0 %3974, %v344_v10  }
  0x2d   : > { %435 = vperm.xlu1 %3977, %v344_v10  }
  0x30   : > { %821 = vperm.xlu0 %3974, %v345_v11  }
  0x31   : > { %440 = vperm.xlu1 %3977, %v345_v11  }
  0x34   : > { %825 = vperm.xlu0 %3974, %v346_v12  }
  0x35   : > { %445 = vperm.xlu1 %3977, %v346_v12  }
  0x38   : > { %829 = vperm.xlu0 %3974, %v347_v13  }
  0x39   : > { %450 = vperm.xlu1 %3977, %v347_v13  }
  0x3c   : > { %833 = vperm.xlu0 %3974, %v348_v14  }
  0x3d   : > { %455 = vperm.xlu1 %3977, %v348_v14  }
  0x40   : > { %837 = vperm.xlu0 %3974, %v349_v15  }
  0x41   : > { %460 = vperm.xlu1 %3977, %v349_v15  }
  0x44   : > { %841 = vperm.xlu0 %3974, %v350_v16  }
  0x45   : > { %465 = vperm.xlu1 %3977, %v350_v16  }
  0x48   : > { %845 = vperm.xlu0 %3974, %v351_v17  }
  0x49   : > { %470 = vperm.xlu1 %3977, %v351_v17  }
  0x4c   : > { %849 = vperm.xlu0 %3974, %v352_v18  }
  0x4d   : > { %475 = vperm.xlu1 %3977, %v352_v18  }
  0x50   : > { %853 = vperm.xlu0 %3974, %v353_v19  }
  0x51   : > { %480 = vperm.xlu1 %3977, %v353_v19  }
  0x54   : > { %857 = vperm.xlu0 %3974, %v354_v20  }
  0x55   : > { %485 = vperm.xlu1 %3977, %v354_v20  }
  0x58   : > { %861 = vperm.xlu0 %3974, %v355_v21  }
  0x59   : > { %490 = vperm.xlu1 %3977, %v355_v21   ;;  %v375_v21 = vld [vmem:[%s4316_s16 + $0x128] sm:$0xff] }
  0x5c   : > { %865 = vperm.xlu0 %3974, %v356_v22  }
  0x5d   : > { %495 = vperm.xlu1 %3977, %v356_v22  }
  0x60   : > { %869 = vperm.xlu0 %3974, %v357_v23  }
  0x61   : > { %500 = vperm.xlu1 %3977, %v357_v23  }
  0x64   : > { %873 = vperm.xlu0 %3974, %v358_v24  }
  0x65   : > { %505 = vperm.xlu1 %3977, %v358_v24  }
  0x68   : > { %877 = vperm.xlu0 %3974, %v359_v25  }
  0x69   : > { %510 = vperm.xlu1 %3977, %v359_v25  }
  0x6c   : > { %881 = vperm.xlu0 %3974, %v360_v26  }
  0x6d   : > { %515 = vperm.xlu1 %3977, %v360_v26  }
  0x70   : > { %885 = vperm.xlu0 %3974, %v361_v27  }
  0x71   : > { %520 = vperm.xlu1 %3977, %v361_v27  }
  0x74   : > { %889 = vperm.xlu0 %3974, %v362_v28  }
  0x75   : > { %525 = vperm.xlu1 %3977, %v362_v28  }
  0x78   : > { %893 = vperm.xlu0 %3974, %v363_v29  }
  0x79   : > { %530 = vperm.xlu1 %3977, %v363_v29  }
  0x7c   : > { %897 = vperm.xlu0 %3974, %v364_v30  }
  0x7d   : > { %535 = vperm.xlu1 %3977, %v364_v30  }
  0x80   : > { %901 = vperm.xlu0 %3974, %v365_v31  }
  0x81   : > { %540 = vperm.xlu1 %3977, %v365_v31  }
  0x84   : > { %905 = vperm.xlu0 %3974, %v366_v32  }
  0x85   : > { %545 = vperm.xlu1 %3977, %v366_v32  }
  0x88   : > { %909 = vperm.xlu0 %3974, %v367_v33  }
  0x89   : > { %550 = vperm.xlu1 %3977, %v367_v33   ;;  %v376_v33 = vld [vmem:[%s4316_s16 + $0x130] sm:$0xff] }
  0x8c   : > { %913 = vperm.xlu0 %3974, %v368_v34  }
  0x8d   : > { %555 = vperm.xlu1 %3977, %v368_v34  }
  0x90   : > { %917 = vperm.xlu0 %3974, %v369_v35  }
  0x91   : > { %560 = vperm.xlu1 %3977, %v369_v35  }
  0x92   : > { %v411_v37 = vpop.permute.xlu1 %410  ;;  %v406_v38 = vpop.permute.xlu0 %405 }
  0x93   : > { %v728_v45 = vmul.f32 %v4357_v39, %v411_v37  ;;  %v727_v46 = vmul.f32 %v4357_v39, %v406_v38 }
  0x94   : > { %921 = vperm.xlu0 %3974, %v370_v36  }
  0x95   : > { %565 = vperm.xlu1 %3977, %v370_v36  }
  0x97   : > { %v798_v42 = vpop.permute.xlu1 %797  ;;  %v794_v43 = vpop.permute.xlu0 %793 }
  0x98   : > { %v1053_v47 = vmul.f32 %v4362_v40, %v798_v42  ;;  %v1052_v48 = vmul.f32 %v4362_v40, %v794_v43  ;;  %925 = vperm.xlu0 %3974, %v371_v41  }
  0x99   : > { %570 = vperm.xlu1 %3977, %v371_v41  }
  0x9a   : > { %v1117_v51 = vadd.f32 %v1053_v47, %v728_v45  ;;  %v1116_v52 = vadd.f32 %v1052_v48, %v727_v46  ;;  %v377_v47 = vld [vmem:[%s4316_s16 + $0x138] sm:$0xff] }
  0x9b   : > { %v802_v53 = vpop.permute.xlu0 %801 }
  0x9c   : > { %v1188_v55 = vadd.f32 %v4372_v49, %v1117_v51  ;;  %v1054_v56 = vmul.f32 %v4362_v40, %v802_v53  ;;  %v416_v57 = vpop.permute.xlu1 %415  ;;  %929 = vperm.xlu0 %3974, %v372_v50   ;;  %v1187_v58 = vadd.f32 %v4372_v49, %v1116_v52 }
  0x9d   : > { %v729_v59 = vmul.f32 %v4357_v39, %v416_v57  ;;  %575 = vperm.xlu1 %3977, %v372_v50  }
  0x9e   : > { %v1254_v61 = vmul.f32 0.15915494, %v1188_v55  ;;  %v1253_v62 = vmul.f32 0.15915494, %v1187_v58 }
  0x9f   : > { %v1118_v63 = vadd.f32 %v1054_v56, %v729_v59  ;;  %v806_v0 = vpop.permute.xlu0 %805 }
  0xa0   : > { %v1055_v2 = vmul.f32 %v4362_v40, %v806_v0  ;;  %v421_v3 = vpop.permute.xlu1 %420  ;;  %933 = vperm.xlu0 %3974, %v373_v60   ;;  %v1317_v4 = vfloor.f32 %v1253_v62  ;;  %v1318_v5 = vfloor.f32 %v1254_v61 }
  0xa1   : > { %v1189_v6 = vadd.f32 %v4372_v49, %v1118_v63  ;;  %v730_v7 = vmul.f32 %v4357_v39, %v421_v3  ;;  %580 = vperm.xlu1 %3977, %v373_v60   ;;  %v378_v60 = vld [vmem:[%s4316_s16 + $0x140] sm:$0xff] }
  0xa2   : > { %v1381_v9 = vmul.f32 6.2831855, %v1317_v4  ;;  %v1382_v10 = vmul.f32 6.2831855, %v1318_v5 }
  0xa3   : > { %v1255_v11 = vmul.f32 0.15915494, %v1189_v6  ;;  %v1119_v12 = vadd.f32 %v1055_v2, %v730_v7  ;;  %v810_v13 = vpop.permute.xlu0 %809 }
  0xa4   : > { %v1056_v15 = vmul.f32 %v4362_v40, %v810_v13  ;;  %v426_v16 = vpop.permute.xlu1 %425  ;;  %937 = vperm.xlu0 %3974, %v374_v8   ;;  %v1445_v17 = vsub.f32 %v1187_v58, %v1381_v9  ;;  %v1446_v18 = vsub.f32 %v1188_v55, %v1382_v10 }
  0xa5   : > { %v1190_v19 = vadd.f32 %v4372_v49, %v1119_v12  ;;  %v731_v20 = vmul.f32 %v4357_v39, %v426_v16  ;;  %585 = vperm.xlu1 %3977, %v374_v8   ;;  %v1319_v22 = vfloor.f32 %v1255_v11  ;;  %v379_v8 = vld [vmem:[%s4316_s16 + $0x148] sm:$0xff] }
  0xa6   : > { %v1522_v23 = vsel %vm4384_vm0, %v1445_v17, %v1187_v58  ;;  %v1523_v24 = vsel %vm4384_vm0, %v1446_v18, %v1188_v55 }
  0xa7   : > { %v1256_v25 = vmul.f32 0.15915494, %v1190_v19  ;;  %v1120_v26 = vadd.f32 %v1056_v15, %v731_v20  ;;  %3545 = vmatprep.mubr.msk.f32.mxu0 %vm1594_vm1, %v1522_v23  ;;  %v814_v27 = vpop.permute.xlu0 %813  ;;  %v1383_v28 = vmul.f32 6.2831855, %v1319_v22 }
  0xa8   : > { %v1057_v29 = vmul.f32 %v4362_v40, %v814_v27  ;;  %v431_v30 = vpop.permute.xlu1 %430  ;;  %941 = vperm.xlu0 %3974, %v375_v21   ;;  %3546 = vmatmul.mubr.msk.f32.vlgmr.msra.gmra.mrb[0].mxu0 %vm1594_vm1, %v1523_v24 }
  0xa9   : > { %v1191_v31 = vadd.f32 %v4372_v49, %v1120_v26  ;;  %v732_v32 = vmul.f32 %v4357_v39, %v431_v30  ;;  %590 = vperm.xlu1 %3977, %v375_v21   ;;  %v1447_v34 = vsub.f32 %v1189_v6, %v1383_v28  ;;  %v1320_v35 = vfloor.f32 %v1256_v25  ;;  %v380_v21 = vld [vmem:[%s4316_s16 + $0x150] sm:$0xff] }
  0xab   : > { %v1257_v36 = vmul.f32 0.15915494, %v1191_v31  ;;  %v1121_v37 = vadd.f32 %v1057_v29, %v732_v32  ;;  %v818_v38 = vpop.permute.xlu0 %817  ;;  %v1524_v41 = vsel %vm4384_vm0, %v1447_v34, %v1189_v6  ;;  %v1384_v42 = vmul.f32 6.2831855, %v1320_v35 }
  0xac   : > { %v1058_v43 = vmul.f32 %v4362_v40, %v818_v38  ;;  %v436_v44 = vpop.permute.xlu1 %435  ;;  %945 = vperm.xlu0 %3974, %v376_v33   ;;  %3548 = vmatprep.mubr.msk.f32.mxu0 %vm1594_vm1, %v1524_v41 }
  0xad   : > { %v1192_v45 = vadd.f32 %v4372_v49, %v1121_v37  ;;  %v733_v46 = vmul.f32 %v4357_v39, %v436_v44  ;;  %595 = vperm.xlu1 %3977, %v376_v33   ;;  %v1448_v48 = vsub.f32 %v1190_v19, %v1384_v42  ;;  %v1321_v50 = vfloor.f32 %v1257_v36  ;;  %v381_v33 = vld [vmem:[%s4316_s16 + $0x158] sm:$0xff] }
  0xaf   : > { %v1258_v51 = vmul.f32 0.15915494, %v1192_v45  ;;  %v1122_v52 = vadd.f32 %v1058_v43, %v733_v46  ;;  %v822_v53 = vpop.permute.xlu0 %821  ;;  %v1525_v54 = vsel %vm4384_vm0, %v1448_v48, %v1190_v19  ;;  %v1385_v55 = vmul.f32 6.2831855, %v1321_v50 }
  0xb0   : > { %v1059_v56 = vmul.f32 %v4362_v40, %v822_v53  ;;  %v441_v57 = vpop.permute.xlu1 %440  ;;  %949 = vperm.xlu0 %3974, %v377_v47   ;;  %3549 = vmatmul.mubr.msk.f32.gmra.mrb[2].mxu0 %vm1594_vm1, %v1525_v54 }
  0xb1   : > { %v1193_v58 = vadd.f32 %v4372_v49, %v1122_v52  ;;  %v734_v59 = vmul.f32 %v4357_v39, %v441_v57  ;;  %600 = vperm.xlu1 %3977, %v377_v47   ;;  %v1449_v61 = vsub.f32 %v1191_v31, %v1385_v55  ;;  %v1322_v62 = vfloor.f32 %v1258_v51  ;;  %v382_v47 = vld [vmem:[%s4316_s16 + $0x160] sm:$0xff] }
  0xb3   : > { %v1259_v63 = vmul.f32 0.15915494, %v1193_v58  ;;  %v1123_v0 = vadd.f32 %v1059_v56, %v734_v59  ;;  %v826_v1 = vpop.permute.xlu0 %825  ;;  %v1526_v2 = vsel %vm4384_vm0, %v1449_v61, %v1191_v31  ;;  %v1386_v3 = vmul.f32 6.2831855, %v1322_v62 }
  0xb4   : > { %v1060_v4 = vmul.f32 %v4362_v40, %v826_v1  ;;  %v446_v5 = vpop.permute.xlu1 %445  ;;  %953 = vperm.xlu0 %3974, %v378_v60   ;;  %3551 = vmatprep.mubr.msk.f32.mxu0 %vm1594_vm1, %v1526_v2 }
  0xb5   : > { %v1194_v6 = vadd.f32 %v4372_v49, %v1123_v0  ;;  %v735_v7 = vmul.f32 %v4357_v39, %v446_v5  ;;  %605 = vperm.xlu1 %3977, %v378_v60   ;;  %v1450_v9 = vsub.f32 %v1192_v45, %v1386_v3  ;;  %v1323_v10 = vfloor.f32 %v1259_v63  ;;  %v383_v60 = vld [vmem:[%s4316_s16 + $0x168] sm:$0xff] }
  0xb7   : > { %v1260_v11 = vmul.f32 0.15915494, %v1194_v6  ;;  %v1124_v12 = vadd.f32 %v1060_v4, %v735_v7  ;;  %v830_v13 = vpop.permute.xlu0 %829  ;;  %v1527_v15 = vsel %vm4384_vm0, %v1450_v9, %v1192_v45  ;;  %v1387_v16 = vmul.f32 6.2831855, %v1323_v10 }
  0xb8   : > { %v1061_v17 = vmul.f32 %v4362_v40, %v830_v13  ;;  %v451_v18 = vpop.permute.xlu1 %450  ;;  %957 = vperm.xlu0 %3974, %v379_v8   ;;  %3552 = vmatmul.mubr.msk.f32.gmra.mrb[4].mxu0 %vm1594_vm1, %v1527_v15 }
  0xb9   : > { %v1195_v19 = vadd.f32 %v4372_v49, %v1124_v12  ;;  %v736_v20 = vmul.f32 %v4357_v39, %v451_v18  ;;  %610 = vperm.xlu1 %3977, %v379_v8   ;;  %v1451_v22 = vsub.f32 %v1193_v58, %v1387_v16  ;;  %v1324_v23 = vfloor.f32 %v1260_v11  ;;  %v384_v8 = vld [vmem:[%s4316_s16 + $0x170] sm:$0xff] }
  0xbb   : > { %v1261_v24 = vmul.f32 0.15915494, %v1195_v19  ;;  %v1125_v25 = vadd.f32 %v1061_v17, %v736_v20  ;;  %v834_v26 = vpop.permute.xlu0 %833  ;;  %v1528_v27 = vsel %vm4384_vm0, %v1451_v22, %v1193_v58  ;;  %v1388_v28 = vmul.f32 6.2831855, %v1324_v23 }
  0xbc   : > { %v1062_v29 = vmul.f32 %v4362_v40, %v834_v26  ;;  %v456_v30 = vpop.permute.xlu1 %455  ;;  %961 = vperm.xlu0 %3974, %v380_v21   ;;  %3554 = vmatprep.mubr.msk.f32.mxu0 %vm1594_vm1, %v1528_v27 }
  0xbd   : > { %v1196_v31 = vadd.f32 %v4372_v49, %v1125_v25  ;;  %v737_v32 = vmul.f32 %v4357_v39, %v456_v30  ;;  %615 = vperm.xlu1 %3977, %v380_v21   ;;  %v1452_v34 = vsub.f32 %v1194_v6, %v1388_v28  ;;  %v1325_v35 = vfloor.f32 %v1261_v24  ;;  %v385_v21 = vld [vmem:[%s4316_s16 + $0x178] sm:$0xff] }
  0xbf   : > { %v1262_v36 = vmul.f32 0.15915494, %v1196_v31  ;;  %v1126_v37 = vadd.f32 %v1062_v29, %v737_v32  ;;  %v838_v38 = vpop.permute.xlu0 %837  ;;  %v1529_v41 = vsel %vm4384_vm0, %v1452_v34, %v1194_v6  ;;  %v1389_v42 = vmul.f32 6.2831855, %v1325_v35 }
  0xc0   : > { %v1063_v43 = vmul.f32 %v4362_v40, %v838_v38  ;;  %v461_v44 = vpop.permute.xlu1 %460  ;;  %965 = vperm.xlu0 %3974, %v381_v33   ;;  %3555 = vmatmul.mubr.msk.f32.gmra.mrb[6].mxu0 %vm1594_vm1, %v1529_v41 }
  0xc1   : > { %v1197_v45 = vadd.f32 %v4372_v49, %v1126_v37  ;;  %v738_v46 = vmul.f32 %v4357_v39, %v461_v44  ;;  %620 = vperm.xlu1 %3977, %v381_v33   ;;  %v1453_v48 = vsub.f32 %v1195_v19, %v1389_v42  ;;  %v1326_v50 = vfloor.f32 %v1262_v36  ;;  %v386_v33 = vld [vmem:[%s4316_s16 + $0x180] sm:$0xff] }
  0xc3   : > { %v1263_v51 = vmul.f32 0.15915494, %v1197_v45  ;;  %v1127_v52 = vadd.f32 %v1063_v43, %v738_v46  ;;  %v842_v53 = vpop.permute.xlu0 %841  ;;  %v1530_v54 = vsel %vm4384_vm0, %v1453_v48, %v1195_v19  ;;  %v1390_v55 = vmul.f32 6.2831855, %v1326_v50 }
  0xc4   : > { %v1064_v56 = vmul.f32 %v4362_v40, %v842_v53  ;;  %v466_v57 = vpop.permute.xlu1 %465  ;;  %969 = vperm.xlu0 %3974, %v382_v47   ;;  %3557 = vmatprep.mubr.msk.f32.mxu0 %vm1594_vm1, %v1530_v54 }
  0xc5   : > { %v1198_v58 = vadd.f32 %v4372_v49, %v1127_v52  ;;  %v739_v59 = vmul.f32 %v4357_v39, %v466_v57  ;;  %625 = vperm.xlu1 %3977, %v382_v47   ;;  %v1454_v61 = vsub.f32 %v1196_v31, %v1390_v55  ;;  %v1327_v62 = vfloor.f32 %v1263_v51  ;;  %v387_v47 = vld [vmem:[%s4316_s16 + $0x188] sm:$0xff] }
  0xc7   : > { %v1264_v63 = vmul.f32 0.15915494, %v1198_v58  ;;  %v1128_v0 = vadd.f32 %v1064_v56, %v739_v59  ;;  %v846_v1 = vpop.permute.xlu0 %845  ;;  %v1531_v2 = vsel %vm4384_vm0, %v1454_v61, %v1196_v31  ;;  %v1391_v3 = vmul.f32 6.2831855, %v1327_v62  ;;  %v388_v61 = vld [vmem:[%s4316_s16 + $0x190] sm:$0xff] }
  0xc8   : > { %v1065_v4 = vmul.f32 %v4362_v40, %v846_v1  ;;  %v471_v5 = vpop.permute.xlu1 %470  ;;  %973 = vperm.xlu0 %3974, %v383_v60   ;;  %3558 = vmatmul.mubr.msk.f32.gmra.mrb[8].mxu0 %vm1594_vm1, %v1531_v2 }
  0xc9   : > { %v1199_v6 = vadd.f32 %v4372_v49, %v1128_v0  ;;  %v740_v7 = vmul.f32 %v4357_v39, %v471_v5  ;;  %630 = vperm.xlu1 %3977, %v383_v60   ;;  %v1455_v9 = vsub.f32 %v1197_v45, %v1391_v3  ;;  %v1328_v10 = vfloor.f32 %v1264_v63 }
  0xcb   : > { %v1265_v11 = vmul.f32 0.15915494, %v1199_v6  ;;  %v1129_v12 = vadd.f32 %v1065_v4, %v740_v7  ;;  %v850_v13 = vpop.permute.xlu0 %849  ;;  %v1532_v15 = vsel %vm4384_vm0, %v1455_v9, %v1197_v45  ;;  %v1392_v16 = vmul.f32 6.2831855, %v1328_v10  ;;  %v389_v9 = vld [vmem:[%s4316_s16 + $0x198] sm:$0xff] }
  0xcc   : > { %v1066_v17 = vmul.f32 %v4362_v40, %v850_v13  ;;  %v476_v18 = vpop.permute.xlu1 %475  ;;  %977 = vperm.xlu0 %3974, %v384_v8   ;;  %3560 = vmatprep.mubr.msk.f32.mxu0 %vm1594_vm1, %v1532_v15 }
  0xcd   : > { %v1200_v19 = vadd.f32 %v4372_v49, %v1129_v12  ;;  %v741_v20 = vmul.f32 %v4357_v39, %v476_v18  ;;  %635 = vperm.xlu1 %3977, %v384_v8   ;;  %v1456_v22 = vsub.f32 %v1198_v58, %v1392_v16  ;;  %v1329_v23 = vfloor.f32 %v1265_v11 }
  0xcf   : > { %v1266_v24 = vmul.f32 0.15915494, %v1200_v19  ;;  %v1130_v25 = vadd.f32 %v1066_v17, %v741_v20  ;;  %v854_v26 = vpop.permute.xlu0 %853  ;;  %v1533_v27 = vsel %vm4384_vm0, %v1456_v22, %v1198_v58  ;;  %v1393_v28 = vmul.f32 6.2831855, %v1329_v23  ;;  %v390_v22 = vld [vmem:[%s4316_s16 + $0x1a0] sm:$0xff] }
  0xd0   : > { %v1067_v29 = vmul.f32 %v4362_v40, %v854_v26  ;;  %v481_v30 = vpop.permute.xlu1 %480  ;;  %981 = vperm.xlu0 %3974, %v385_v21   ;;  %3561 = vmatmul.mubr.msk.f32.gmra.mrb[10].mxu0 %vm1594_vm1, %v1533_v27 }
  0xd1   : > { %v1201_v31 = vadd.f32 %v4372_v49, %v1130_v25  ;;  %v742_v32 = vmul.f32 %v4357_v39, %v481_v30  ;;  %640 = vperm.xlu1 %3977, %v385_v21   ;;  %v1457_v34 = vsub.f32 %v1199_v6, %v1393_v28  ;;  %v1330_v35 = vfloor.f32 %v1266_v24 }
  0xd3   : > { %v1267_v36 = vmul.f32 0.15915494, %v1201_v31  ;;  %v1131_v37 = vadd.f32 %v1067_v29, %v742_v32  ;;  %v858_v38 = vpop.permute.xlu0 %857  ;;  %v1534_v41 = vsel %vm4384_vm0, %v1457_v34, %v1199_v6  ;;  %v1394_v42 = vmul.f32 6.2831855, %v1330_v35  ;;  %v391_v34 = vld [vmem:[%s4316_s16 + $0x1a8] sm:$0xff] }
  0xd4   : > { %v1068_v43 = vmul.f32 %v4362_v40, %v858_v38  ;;  %v486_v44 = vpop.permute.xlu1 %485  ;;  %985 = vperm.xlu0 %3974, %v386_v33   ;;  %3563 = vmatprep.mubr.msk.f32.mxu0 %vm1594_vm1, %v1534_v41 }
  0xd5   : > { %v1202_v45 = vadd.f32 %v4372_v49, %v1131_v37  ;;  %v743_v46 = vmul.f32 %v4357_v39, %v486_v44  ;;  %645 = vperm.xlu1 %3977, %v386_v33   ;;  %v1458_v48 = vsub.f32 %v1200_v19, %v1394_v42  ;;  %v1331_v50 = vfloor.f32 %v1267_v36 }
  0xd7   : > { %v1268_v51 = vmul.f32 0.15915494, %v1202_v45  ;;  %v1132_v52 = vadd.f32 %v1068_v43, %v743_v46  ;;  %v862_v53 = vpop.permute.xlu0 %861  ;;  %v1535_v54 = vsel %vm4384_vm0, %v1458_v48, %v1200_v19  ;;  %v1395_v55 = vmul.f32 6.2831855, %v1331_v50  ;;  %v392_v48 = vld [vmem:[%s4316_s16 + $0x1b0] sm:$0xff] }
  0xd8   : > { %v1069_v56 = vmul.f32 %v4362_v40, %v862_v53  ;;  %v491_v57 = vpop.permute.xlu1 %490  ;;  %989 = vperm.xlu0 %3974, %v387_v47   ;;  %3564 = vmatmul.mubr.msk.f32.gmra.mrb[12].mxu0 %vm1594_vm1, %v1535_v54 }
  0xd9   : > { %v1332_v58 = vfloor.f32 %v1268_v51  ;;  %v1203_v59 = vadd.f32 %v4372_v49, %v1132_v52  ;;  %v744_v60 = vmul.f32 %v4357_v39, %v491_v57  ;;  %650 = vperm.xlu1 %3977, %v387_v47   ;;  %v1459_v62 = vsub.f32 %v1201_v31, %v1395_v55 }
  0xdb   : > { %v1269_v63 = vmul.f32 0.15915494, %v1203_v59  ;;  %v1133_v0 = vadd.f32 %v1069_v56, %v744_v60  ;;  %v866_v1 = vpop.permute.xlu0 %865  ;;  %v1536_v2 = vsel %vm4384_vm0, %v1459_v62, %v1201_v31  ;;  %v1396_v3 = vmul.f32 6.2831855, %v1332_v58 }
  0xdc   : > { %v1070_v4 = vmul.f32 %v4362_v40, %v866_v1  ;;  %v496_v5 = vpop.permute.xlu1 %495  ;;  %993 = vperm.xlu0 %3974, %v388_v61   ;;  %3566 = vmatprep.mubr.msk.f32.mxu0 %vm1594_vm1, %v1536_v2 }
  0xdd   : > { %v1333_v6 = vfloor.f32 %v1269_v63  ;;  %v1204_v7 = vadd.f32 %v4372_v49, %v1133_v0  ;;  %v745_v8 = vmul.f32 %v4357_v39, %v496_v5  ;;  %655 = vperm.xlu1 %3977, %v388_v61   ;;  %v1460_v10 = vsub.f32 %v1202_v45, %v1396_v3  ;;  %v393_v61 = vld [vmem:[%s4316_s16 + $0x1b8] sm:$0xff] }
  0xdf   : > { %v1270_v11 = vmul.f32 0.15915494, %v1204_v7  ;;  %v1134_v12 = vadd.f32 %v1070_v4, %v745_v8  ;;  %v870_v13 = vpop.permute.xlu0 %869  ;;  %v1537_v15 = vsel %vm4384_vm0, %v1460_v10, %v1202_v45  ;;  %v1397_v16 = vmul.f32 6.2831855, %v1333_v6 }
  0xe0   : > { %v1071_v17 = vmul.f32 %v4362_v40, %v870_v13  ;;  %v501_v18 = vpop.permute.xlu1 %500  ;;  %997 = vperm.xlu0 %3974, %v389_v9   ;;  %3567 = vmatmul.mubr.msk.f32.gmra.mrb[14].mxu0 %vm1594_vm1, %v1537_v15 }
  0xe1   : > { %v1334_v19 = vfloor.f32 %v1270_v11  ;;  %v1205_v20 = vadd.f32 %v4372_v49, %v1134_v12  ;;  %v746_v21 = vmul.f32 %v4357_v39, %v501_v18  ;;  %660 = vperm.xlu1 %3977, %v389_v9   ;;  %v1461_v23 = vsub.f32 %v1203_v59, %v1397_v16  ;;  %v394_v9 = vld [vmem:[%s4316_s16 + $0x1c0] sm:$0xff] }
  0xe3   : > { %v1271_v24 = vmul.f32 0.15915494, %v1205_v20  ;;  %v1135_v25 = vadd.f32 %v1071_v17, %v746_v21  ;;  %v874_v26 = vpop.permute.xlu0 %873  ;;  %v1538_v27 = vsel %vm4384_vm0, %v1461_v23, %v1203_v59  ;;  %v1398_v28 = vmul.f32 6.2831855, %v1334_v19 }
  0xe4   : > { %v1072_v29 = vmul.f32 %v4362_v40, %v874_v26  ;;  %v506_v30 = vpop.permute.xlu1 %505  ;;  %1001 = vperm.xlu0 %3974, %v390_v22   ;;  %3569 = vmatprep.mubr.msk.f32.mxu0 %vm1594_vm1, %v1538_v27 }
  0xe5   : > { %v1335_v31 = vfloor.f32 %v1271_v24  ;;  %v1206_v32 = vadd.f32 %v4372_v49, %v1135_v25  ;;  %v747_v33 = vmul.f32 %v4357_v39, %v506_v30  ;;  %665 = vperm.xlu1 %3977, %v390_v22   ;;  %v1462_v35 = vsub.f32 %v1204_v7, %v1398_v28  ;;  %v395_v22 = vld [vmem:[%s4316_s16 + $0x1c8] sm:$0xff] }
  0xe7   : > { %v1272_v36 = vmul.f32 0.15915494, %v1206_v32  ;;  %v1136_v37 = vadd.f32 %v1072_v29, %v747_v33  ;;  %v878_v38 = vpop.permute.xlu0 %877  ;;  %v1539_v41 = vsel %vm4384_vm0, %v1462_v35, %v1204_v7  ;;  %v1399_v42 = vmul.f32 6.2831855, %v1335_v31 }
  0xe8   : > { %v1073_v43 = vmul.f32 %v4362_v40, %v878_v38  ;;  %v511_v44 = vpop.permute.xlu1 %510  ;;  %1005 = vperm.xlu0 %3974, %v391_v34   ;;  %3570 = vmatmul.mubr.msk.f32.gmra.mrb[16].mxu0 %vm1594_vm1, %v1539_v41 }
  0xe9   : > { %v1336_v45 = vfloor.f32 %v1272_v36  ;;  %v1207_v46 = vadd.f32 %v4372_v49, %v1136_v37  ;;  %v748_v47 = vmul.f32 %v4357_v39, %v511_v44  ;;  %670 = vperm.xlu1 %3977, %v391_v34   ;;  %v1463_v50 = vsub.f32 %v1205_v20, %v1399_v42  ;;  %v396_v34 = vld [vmem:[%s4316_s16 + $0x1d0] sm:$0xff] }
  0xeb   : > { %v1273_v51 = vmul.f32 0.15915494, %v1207_v46  ;;  %v1137_v52 = vadd.f32 %v1073_v43, %v748_v47  ;;  %v882_v53 = vpop.permute.xlu0 %881  ;;  %v1540_v54 = vsel %vm4384_vm0, %v1463_v50, %v1205_v20  ;;  %v1400_v55 = vmul.f32 6.2831855, %v1336_v45 }
  0xec   : > { %v1074_v56 = vmul.f32 %v4362_v40, %v882_v53  ;;  %v516_v57 = vpop.permute.xlu1 %515  ;;  %1009 = vperm.xlu0 %3974, %v392_v48   ;;  %3572 = vmatprep.mubr.msk.f32.mxu0 %vm1594_vm1, %v1540_v54 }
  0xed   : > { %v1337_v58 = vfloor.f32 %v1273_v51  ;;  %v1208_v59 = vadd.f32 %v4372_v49, %v1137_v52  ;;  %v749_v60 = vmul.f32 %v4357_v39, %v516_v57  ;;  %675 = vperm.xlu1 %3977, %v392_v48   ;;  %v1464_v62 = vsub.f32 %v1206_v32, %v1400_v55  ;;  %v397_v48 = vld [vmem:[%s4316_s16 + $0x1d8] sm:$0xff] }
  0xef   : > { %v1274_v63 = vmul.f32 0.15915494, %v1208_v59  ;;  %v1138_v0 = vadd.f32 %v1074_v56, %v749_v60  ;;  %v886_v1 = vpop.permute.xlu0 %885  ;;  %v1541_v2 = vsel %vm4384_vm0, %v1464_v62, %v1206_v32  ;;  %v1401_v3 = vmul.f32 6.2831855, %v1337_v58 }
  0xf0   : > { %v1075_v4 = vmul.f32 %v4362_v40, %v886_v1  ;;  %v521_v5 = vpop.permute.xlu1 %520  ;;  %1013 = vperm.xlu0 %3974, %v393_v61   ;;  %3573 = vmatmul.mubr.msk.f32.gmra.mrb[18].mxu0 %vm1594_vm1, %v1541_v2 }
  0xf1   : > { %v1338_v6 = vfloor.f32 %v1274_v63  ;;  %v1209_v7 = vadd.f32 %v4372_v49, %v1138_v0  ;;  %v750_v8 = vmul.f32 %v4357_v39, %v521_v5  ;;  %680 = vperm.xlu1 %3977, %v393_v61   ;;  %v1465_v10 = vsub.f32 %v1207_v46, %v1401_v3  ;;  %v398_v61 = vld [vmem:[%s4316_s16 + $0x1e0] sm:$0xff]  ;;  %v2237_v0 = vld [vmem:[%s5259_s5 + $0x8] sm:$0xff] }
  0xf2   : > { %v2236_v63 = vld [vmem:[%s5259_s5] sm:$0xff] }
  0xf3   : > { %v1275_v11 = vmul.f32 0.15915494, %v1209_v7  ;;  %v1139_v12 = vadd.f32 %v1075_v4, %v750_v8  ;;  %v890_v13 = vpop.permute.xlu0 %889  ;;  %v1542_v15 = vsel %vm4384_vm0, %v1465_v10, %v1207_v46  ;;  %v1402_v16 = vmul.f32 6.2831855, %v1338_v6 }
  0xf4   : > { %v1076_v17 = vmul.f32 %v4362_v40, %v890_v13  ;;  %v526_v18 = vpop.permute.xlu1 %525  ;;  %1017 = vperm.xlu0 %3974, %v394_v9   ;;  %3575 = vmatprep.mubr.msk.f32.mxu0 %vm1594_vm1, %v1542_v15  ;;  %v4566_v8 = vpack.c.bf16 %v2237_v0, %v2236_v63 }
  0xf5   : > { %v1339_v19 = vfloor.f32 %v1275_v11  ;;  %v1210_v20 = vadd.f32 %v4372_v49, %v1139_v12  ;;  %v751_v21 = vmul.f32 %v4357_v39, %v526_v18  ;;  %685 = vperm.xlu1 %3977, %v394_v9   ;;  %v1466_v23 = vsub.f32 %v1208_v59, %v1402_v16  ;;  %v399_v12 = vld [vmem:[%s4316_s16 + $0x1e8] sm:$0xff] }
  0xf6   : > { %3898 = vmatprep.subr.bf16.mxu1 %v4566_v8 }
  0xf7   : > { %v1276_v24 = vmul.f32 0.15915494, %v1210_v20  ;;  %v1140_v25 = vadd.f32 %v1076_v17, %v751_v21  ;;  %v894_v26 = vpop.permute.xlu0 %893  ;;  %v1543_v27 = vsel %vm4384_vm0, %v1466_v23, %v1208_v59  ;;  %v1403_v28 = vmul.f32 6.2831855, %v1339_v19 }
  0xf8   : > { %v1077_v29 = vmul.f32 %v4362_v40, %v894_v26  ;;  %v531_v30 = vpop.permute.xlu1 %530  ;;  %1021 = vperm.xlu0 %3974, %v395_v22   ;;  %3576 = vmatmul.mubr.msk.f32.gmra.mrb[20].mxu0 %vm1594_vm1, %v1543_v27 }
  0xf9   : > { %v1340_v31 = vfloor.f32 %v1276_v24  ;;  %v1211_v32 = vadd.f32 %v4372_v49, %v1140_v25  ;;  %v752_v33 = vmul.f32 %v4357_v39, %v531_v30  ;;  %690 = vperm.xlu1 %3977, %v395_v22   ;;  %v1467_v35 = vsub.f32 %v1209_v7, %v1403_v28  ;;  %v400_v25 = vld [vmem:[%s4316_s16 + $0x1f0] sm:$0xff] }
  0xfb   : > { %v1277_v36 = vmul.f32 0.15915494, %v1211_v32  ;;  %v1141_v37 = vadd.f32 %v1077_v29, %v752_v33  ;;  %v898_v38 = vpop.permute.xlu0 %897  ;;  %v1544_v41 = vsel %vm4384_vm0, %v1467_v35, %v1209_v7  ;;  %v1404_v42 = vmul.f32 6.2831855, %v1340_v31 }
  0xfc   : > { %v1078_v43 = vmul.f32 %v4362_v40, %v898_v38  ;;  %v536_v44 = vpop.permute.xlu1 %535  ;;  %1025 = vperm.xlu0 %3974, %v396_v34   ;;  %3578 = vmatprep.mubr.msk.f32.mxu0 %vm1594_vm1, %v1544_v41 }
  0xfd   : > { %v1341_v45 = vfloor.f32 %v1277_v36  ;;  %v1212_v46 = vadd.f32 %v4372_v49, %v1141_v37  ;;  %v753_v47 = vmul.f32 %v4357_v39, %v536_v44  ;;  %695 = vperm.xlu1 %3977, %v396_v34   ;;  %v1468_v50 = vsub.f32 %v1210_v20, %v1404_v42  ;;  %v401_v37 = vld [vmem:[%s4316_s16 + $0x1f8] sm:$0xff] }
  0xff   : > { %v1278_v51 = vmul.f32 0.15915494, %v1212_v46  ;;  %v1142_v52 = vadd.f32 %v1078_v43, %v753_v47  ;;  %v902_v53 = vpop.permute.xlu0 %901  ;;  %v1545_v54 = vsel %vm4384_vm0, %v1468_v50, %v1210_v20  ;;  %v1405_v55 = vmul.f32 6.2831855, %v1341_v45 }
 0x100   : > { %v1079_v56 = vmul.f32 %v4362_v40, %v902_v53  ;;  %v541_v57 = vpop.permute.xlu1 %540  ;;  %1029 = vperm.xlu0 %3974, %v397_v48   ;;  %3579 = vmatmul.mubr.msk.f32.gmra.mrb[22].mxu0 %vm1594_vm1, %v1545_v54 }
 0x101   : > { %v1342_v58 = vfloor.f32 %v1278_v51  ;;  %v1213_v59 = vadd.f32 %v4372_v49, %v1142_v52  ;;  %v754_v60 = vmul.f32 %v4357_v39, %v541_v57  ;;  %700 = vperm.xlu1 %3977, %v397_v48   ;;  %v1469_v62 = vsub.f32 %v1211_v32, %v1405_v55 }
 0x103   : > { %v1279_v1 = vmul.f32 0.15915494, %v1213_v59  ;;  %v1143_v2 = vadd.f32 %v1079_v56, %v754_v60  ;;  %v906_v3 = vpop.permute.xlu0 %905  ;;  %v1546_v4 = vsel %vm4384_vm0, %v1469_v62, %v1211_v32  ;;  %v1406_v5 = vmul.f32 6.2831855, %v1342_v58 }
 0x104   : > { %v1080_v6 = vmul.f32 %v4362_v40, %v906_v3  ;;  %v546_v7 = vpop.permute.xlu1 %545  ;;  %1033 = vperm.xlu0 %3974, %v398_v61   ;;  %3581 = vmatprep.mubr.msk.f32.mxu0 %vm1594_vm1, %v1546_v4 }
 0x105   : > { %v1343_v9 = vfloor.f32 %v1279_v1  ;;  %v1214_v10 = vadd.f32 %v4372_v49, %v1143_v2  ;;  %v755_v11 = vmul.f32 %v4357_v39, %v546_v7  ;;  %705 = vperm.xlu1 %3977, %v398_v61   ;;  %v1470_v13 = vsub.f32 %v1212_v46, %v1406_v5 }
 0x107   : > { %v1280_v15 = vmul.f32 0.15915494, %v1214_v10  ;;  %v1144_v16 = vadd.f32 %v1080_v6, %v755_v11  ;;  %v910_v17 = vpop.permute.xlu0 %909  ;;  %v1547_v18 = vsel %vm4384_vm0, %v1470_v13, %v1212_v46  ;;  %v1407_v19 = vmul.f32 6.2831855, %v1343_v9 }
 0x108   : > { %v1081_v20 = vmul.f32 %v4362_v40, %v910_v17  ;;  %v551_v21 = vpop.permute.xlu1 %550  ;;  %1037 = vperm.xlu0 %3974, %v399_v12   ;;  %3582 = vmatmul.mubr.msk.f32.gmra.mrb[24].mxu0 %vm1594_vm1, %v1547_v18 }
 0x109   : > { %v1344_v22 = vfloor.f32 %v1280_v15  ;;  %v1215_v23 = vadd.f32 %v4372_v49, %v1144_v16  ;;  %v756_v24 = vmul.f32 %v4357_v39, %v551_v21  ;;  %710 = vperm.xlu1 %3977, %v399_v12   ;;  %v1471_v26 = vsub.f32 %v1213_v59, %v1407_v19 }
 0x10b   : > { %v1281_v27 = vmul.f32 0.15915494, %v1215_v23  ;;  %v1145_v28 = vadd.f32 %v1081_v20, %v756_v24  ;;  %v914_v29 = vpop.permute.xlu0 %913  ;;  %v1548_v30 = vsel %vm4384_vm0, %v1471_v26, %v1213_v59  ;;  %v1408_v31 = vmul.f32 6.2831855, %v1344_v22 }
 0x10c   : > { %v1082_v32 = vmul.f32 %v4362_v40, %v914_v29  ;;  %v556_v33 = vpop.permute.xlu1 %555  ;;  %1041 = vperm.xlu0 %3974, %v400_v25   ;;  %3584 = vmatprep.mubr.msk.f32.mxu0 %vm1594_vm1, %v1548_v30 }
 0x10d   : > { %v1345_v34 = vfloor.f32 %v1281_v27  ;;  %v1216_v35 = vadd.f32 %v4372_v49, %v1145_v28  ;;  %v757_v36 = vmul.f32 %v4357_v39, %v556_v33  ;;  %715 = vperm.xlu1 %3977, %v400_v25   ;;  %v1472_v38 = vsub.f32 %v1214_v10, %v1408_v31 }
 0x10f   : > { %v1282_v41 = vmul.f32 0.15915494, %v1216_v35  ;;  %v1146_v42 = vadd.f32 %v1082_v32, %v757_v36  ;;  %v918_v43 = vpop.permute.xlu0 %917  ;;  %v1549_v44 = vsel %vm4384_vm0, %v1472_v38, %v1214_v10  ;;  %v1409_v45 = vmul.f32 6.2831855, %v1345_v34 }
 0x110   : > { %v1083_v46 = vmul.f32 %v4362_v40, %v918_v43  ;;  %v561_v47 = vpop.permute.xlu1 %560  ;;  %1045 = vperm.xlu0 %3974, %v401_v37   ;;  %3585 = vmatmul.mubr.msk.f32.gmra.mrb[26].mxu0 %vm1594_vm1, %v1549_v44 }
 0x111   : > { %v1346_v48 = vfloor.f32 %v1282_v41  ;;  %v1217_v50 = vadd.f32 %v4372_v49, %v1146_v42  ;;  %v758_v51 = vmul.f32 %v4357_v39, %v561_v47  ;;  %720 = vperm.xlu1 %3977, %v401_v37   ;;  %v1473_v52 = vsub.f32 %v1215_v23, %v1409_v45  ;;  %v2238_v41 = vld [vmem:[%s5259_s5 + $0x10] sm:$0xff]  ;;  %v4632_v42 = vld [vmem:[%s5255_s1 + $0x1] ss:$0 sm:$0xff] }
 0x113   : > { %v1283_v53 = vmul.f32 0.15915494, %v1217_v50  ;;  %v1147_v54 = vadd.f32 %v1083_v46, %v758_v51  ;;  %v922_v55 = vpop.permute.xlu0 %921  ;;  %v1550_v56 = vsel %vm4384_vm0, %v1473_v52, %v1215_v23  ;;  %v1410_v57 = vmul.f32 6.2831855, %v1346_v48  ;;  %v4639_v46 = vld [vmem:[%s5256_s2] ss:$0 sm:$0xff] }
 0x114   : > { %v1084_v58 = vmul.f32 %v4362_v40, %v922_v55  ;;  %v566_v59 = vpop.permute.xlu1 %565  ;;  %3587 = vmatprep.mubr.msk.f32.mxu0 %vm1594_vm1, %v1550_v56 }
 0x115   : > { %v1347_v60 = vfloor.f32 %v1283_v53  ;;  %v1218_v61 = vadd.f32 %v4372_v49, %v1147_v54  ;;  %v759_v62 = vmul.f32 %v4357_v39, %v566_v59  ;;  %v1474_v63 = vsub.f32 %v1216_v35, %v1410_v57  ;;  %v2240_v57 = vld [vmem:[%s5259_s5 + $0x20] sm:$0xff] }
 0x117   : > { %v1284_v0 = vmul.f32 0.15915494, %v1218_v61  ;;  %v1148_v1 = vadd.f32 %v1084_v58, %v759_v62  ;;  %v926_v2 = vpop.permute.xlu0 %925  ;;  %v1551_v3 = vsel %vm4384_vm0, %v1474_v63, %v1216_v35  ;;  %v1411_v4 = vmul.f32 6.2831855, %v1347_v60  ;;  %v2241_v58 = vld [vmem:[%s5259_s5 + $0x28] sm:$0xff] }
 0x118   : > { %v1085_v5 = vmul.f32 %v4362_v40, %v926_v2  ;;  %v571_v6 = vpop.permute.xlu1 %570  ;;  %3588 = vmatmul.mubr.msk.f32.gmra.mrb[28].mxu0 %vm1594_vm1, %v1551_v3 }
 0x119   : > { %v1348_v7 = vfloor.f32 %v1284_v0  ;;  %v1219_v9 = vadd.f32 %v4372_v49, %v1148_v1  ;;  %v760_v10 = vmul.f32 %v4357_v39, %v571_v6  ;;  %v1475_v11 = vsub.f32 %v1217_v50, %v1411_v4 }
 0x11a   : > { %v3905_v1 = vpack.c.bf16 %v2241_v58, %v2240_v57 }
 0x11b   : > { %v1149_v12 = vadd.f32 %v1085_v5, %v760_v10  ;;  %v930_v13 = vpop.permute.xlu0 %929  ;;  %v1552_v15 = vsel %vm4384_vm0, %v1475_v11, %v1217_v50  ;;  %v1412_v16 = vmul.f32 6.2831855, %v1348_v7  ;;  %v1285_v17 = vmul.f32 0.15915494, %v1219_v9  ;;  %v2242_v7 = vld [vmem:[%s5259_s5 + $0x30] sm:$0xff] }
 0x11c   : > { %v1086_v18 = vmul.f32 %v4362_v40, %v930_v13  ;;  %v576_v19 = vpop.permute.xlu1 %575  ;;  %3590 = vmatprep.mubr.msk.f32.mxu0 %vm1594_vm1, %v1552_v15 }
 0x11d   : > { %v1220_v20 = vadd.f32 %v4372_v49, %v1149_v12  ;;  %v761_v21 = vmul.f32 %v4357_v39, %v576_v19  ;;  %v1476_v22 = vsub.f32 %v1218_v61, %v1412_v16  ;;  %v1349_v23 = vfloor.f32 %v1285_v17  ;;  %v4618_v39 = vld [vmem:[%s5255_s1] ss:$0 sm:$0xff] }
 0x11f   : > { %v1286_v24 = vmul.f32 0.15915494, %v1220_v20  ;;  %v1150_v25 = vadd.f32 %v1086_v18, %v761_v21  ;;  %v934_v26 = vpop.permute.xlu0 %933  ;;  %v1553_v27 = vsel %vm4384_vm0, %v1476_v22, %v1218_v61  ;;  %v1413_v28 = vmul.f32 6.2831855, %v1349_v23  ;;  %v2244_v22 = vld [vmem:[%s5259_s5 + $0x40] sm:$0xff]  ;;  %v2245_v23 = vld [vmem:[%s5259_s5 + $0x48] sm:$0xff] }
 0x120   : > { %v1087_v29 = vmul.f32 %v4362_v40, %v934_v26  ;;  %v581_v30 = vpop.permute.xlu1 %580  ;;  %3591 = vmatmul.mubr.msk.f32.gmra.mrb[30].mxu0 %vm1594_vm1, %v1553_v27 }
 0x121   : > { %v1350_v31 = vfloor.f32 %v1286_v24  ;;  %v1221_v32 = vadd.f32 %v4372_v49, %v1150_v25  ;;  %v762_v33 = vmul.f32 %v4618_v39, %v581_v30  ;;  %v1477_v34 = vsub.f32 %v1219_v9, %v1413_v28  ;;  %v2239_v49 = vld [vmem:[%s5259_s5 + $0x18] sm:$0xff] }
 0x122   : > { %v3901_v51 = vpack.c.bf16 %v2239_v49, %v2238_v41  ;;  %v3913_v30 = vpack.c.bf16 %v2245_v23, %v2244_v22 }
 0x123   : > { %v1287_v35 = vmul.f32 0.15915494, %v1221_v32  ;;  %v1151_v36 = vadd.f32 %v1087_v29, %v762_v33  ;;  %v938_v37 = vpop.permute.xlu0 %937  ;;  %v1554_v40 = vsel %vm4384_vm0, %v1477_v34, %v1219_v9  ;;  %v1414_v38 = vmul.f32 6.2831855, %v1350_v31  ;;  %v2243_v9 = vld [vmem:[%s5259_s5 + $0x38] sm:$0xff] }
 0x124   : > { %v1088_v43 = vmul.f32 %v4632_v42, %v938_v37  ;;  %v586_v44 = vpop.permute.xlu1 %585  ;;  %3593 = vmatprep.mubr.msk.f32.mxu1 %vm1594_vm1, %v1554_v40  ;;  %v3909_v16 = vpack.c.bf16 %v2243_v9, %v2242_v7  ;;  %v2247_v37 = vld [vmem:[%s5259_s5 + $0x58] sm:$0xff] }
 0x125   : > { %v1351_v45 = vfloor.f32 %v1287_v35  ;;  %v1222_v47 = vadd.f32 %v4639_v46, %v1151_v36  ;;  %v763_v48 = vmul.f32 %v4618_v39, %v586_v44  ;;  %v1478_v50 = vsub.f32 %v1220_v20, %v1414_v38  ;;  %v2246_v36 = vld [vmem:[%s5259_s5 + $0x50] sm:$0xff] }
 0x127   : > { %v1288_v52 = vmul.f32 0.15915494, %v1222_v47  ;;  %v1152_v53 = vadd.f32 %v1088_v43, %v763_v48  ;;  %v942_v54 = vpop.permute.xlu0 %941  ;;  %v1555_v55 = vsel %vm4384_vm0, %v1478_v50, %v1220_v20  ;;  %v1415_v56 = vmul.f32 6.2831855, %v1351_v45 }
 0x128   : > { %v1089_v59 = vmul.f32 %v4632_v42, %v942_v54  ;;  %v591_v60 = vpop.permute.xlu1 %590  ;;  %3594 = vmatmul.mubr.msk.f32.vlgmr.msra.gmra.mrb[0].mxu1 %vm1594_vm1, %v1555_v55  ;;  %v3917_v45 = vpack.c.bf16 %v2247_v37, %v2246_v36  ;;  %v2249_v54 = vld [vmem:[%s5259_s5 + $0x68] sm:$0xff] }
 0x129   : > { %v1352_v61 = vfloor.f32 %v1288_v52  ;;  %v1223_v62 = vadd.f32 %v4639_v46, %v1152_v53  ;;  %v764_v63 = vmul.f32 %v4618_v39, %v591_v60  ;;  %v1479_v0 = vsub.f32 %v1221_v32, %v1415_v56  ;;  %3900 = vmatpush3.bf16.msra.mxu1 %v4566_v8  ;;  %v2248_v53 = vld [vmem:[%s5259_s5 + $0x60] sm:$0xff] }
 0x12a   : > { %3902 = vmatprep.subr.bf16.mxu1 %v3901_v51 }
 0x12b   : > { %v1289_v2 = vmul.f32 0.15915494, %v1223_v62  ;;  %v1153_v3 = vadd.f32 %v1089_v59, %v764_v63  ;;  %v946_v4 = vpop.permute.xlu0 %945  ;;  %v1556_v5 = vsel %vm4384_vm0, %v1479_v0, %v1221_v32  ;;  %v1416_v6 = vmul.f32 6.2831855, %v1352_v61 }
 0x12c   : > { %v1090_v10 = vmul.f32 %v4632_v42, %v946_v4  ;;  %v596_v8 = vpop.permute.xlu1 %595  ;;  %3596 = vmatprep.mubr.msk.f32.mxu1 %vm1594_vm1, %v1556_v5  ;;  %v3921_v61 = vpack.c.bf16 %v2249_v54, %v2248_v53  ;;  %v2251_v4 = vld [vmem:[%s5259_s5 + $0x78] sm:$0xff] }
 0x12d   : > { %v1353_v11 = vfloor.f32 %v1289_v2  ;;  %v1224_v12 = vadd.f32 %v4639_v46, %v1153_v3  ;;  %v765_v13 = vmul.f32 %v4618_v39, %v596_v8  ;;  %v1480_v15 = vsub.f32 %v1222_v47, %v1416_v6  ;;  %3904 = vmatpush3.bf16.msra.mxu1 %v3901_v51  ;;  %v2250_v3 = vld [vmem:[%s5259_s5 + $0x70] sm:$0xff] }
 0x12e   : > { %3906 = vmatprep.subr.bf16.mxu1 %v3905_v1 }
 0x12f   : > { %v1290_v17 = vmul.f32 0.15915494, %v1224_v12  ;;  %v1154_v18 = vadd.f32 %v1090_v10, %v765_v13  ;;  %v950_v19 = vpop.permute.xlu0 %949  ;;  %v1557_v20 = vsel %vm4384_vm0, %v1480_v15, %v1222_v47  ;;  %v1417_v21 = vmul.f32 6.2831855, %v1353_v11 }
 0x130   : > { %v1091_v24 = vmul.f32 %v4632_v42, %v950_v19  ;;  %v601_v25 = vpop.permute.xlu1 %600  ;;  %3597 = vmatmul.mubr.msk.f32.gmra.mrb[2].mxu1 %vm1594_vm1, %v1557_v20  ;;  %v3925_v11 = vpack.c.bf16 %v2251_v4, %v2250_v3 }
 0x131   : > { %v1354_v26 = vfloor.f32 %v1290_v17  ;;  %v1225_v27 = vadd.f32 %v4639_v46, %v1154_v18  ;;  %v766_v28 = vmul.f32 %v4618_v39, %v601_v25  ;;  %v1481_v29 = vsub.f32 %v1223_v62, %v1417_v21  ;;  %3908 = vmatpush3.bf16.msra.mxu1 %v3905_v1 }
 0x132   : > { %3910 = vmatprep.subr.bf16.mxu1 %v3909_v16 }
 0x133   : > { %v1291_v31 = vmul.f32 0.15915494, %v1225_v27  ;;  %v1155_v32 = vadd.f32 %v1091_v24, %v766_v28  ;;  %v954_v33 = vpop.permute.xlu0 %953  ;;  %v1558_v34 = vsel %vm4384_vm0, %v1481_v29, %v1223_v62  ;;  %v1418_v35 = vmul.f32 6.2831855, %v1354_v26 }
 0x134   : > { %v1092_v40 = vmul.f32 %v4632_v42, %v954_v33  ;;  %v606_v38 = vpop.permute.xlu1 %605  ;;  %3599 = vmatprep.mubr.msk.f32.mxu1 %vm1594_vm1, %v1558_v34 }
 0x135   : > { %v1355_v41 = vfloor.f32 %v1291_v31  ;;  %v1226_v49 = vadd.f32 %v4639_v46, %v1155_v32  ;;  %v767_v43 = vmul.f32 %v4618_v39, %v606_v38  ;;  %v1482_v44 = vsub.f32 %v1224_v12, %v1418_v35  ;;  %3912 = vmatpush3.bf16.msra.mxu1 %v3909_v16 }
 0x136   : > { %3914 = vmatprep.subr.bf16.mxu1 %v3913_v30 }
 0x137   : > { %v1292_v47 = vmul.f32 0.15915494, %v1226_v49  ;;  %v1156_v48 = vadd.f32 %v1092_v40, %v767_v43  ;;  %v958_v50 = vpop.permute.xlu0 %957  ;;  %v1559_v51 = vsel %vm4384_vm0, %v1482_v44, %v1224_v12  ;;  %v1419_v52 = vmul.f32 6.2831855, %v1355_v41 }
 0x138   : > { %v1093_v55 = vmul.f32 %v4632_v42, %v958_v50  ;;  %v611_v56 = vpop.permute.xlu1 %610  ;;  %3600 = vmatmul.mubr.msk.f32.gmra.mrb[4].mxu1 %vm1594_vm1, %v1559_v51 }
 0x139   : > { %v1356_v57 = vfloor.f32 %v1292_v47  ;;  %v1227_v58 = vadd.f32 %v4639_v46, %v1156_v48  ;;  %v768_v59 = vmul.f32 %v4618_v39, %v611_v56  ;;  %v1483_v60 = vsub.f32 %v1225_v27, %v1419_v52  ;;  %3916 = vmatpush3.bf16.msra.mxu1 %v3913_v30 }
 0x13a   : > { %3918 = vmatprep.subr.bf16.mxu1 %v3917_v45 }
 0x13b   : > { %v1293_v62 = vmul.f32 0.15915494, %v1227_v58  ;;  %v1157_v63 = vadd.f32 %v1093_v55, %v768_v59  ;;  %v962_v0 = vpop.permute.xlu0 %961  ;;  %v1560_v1 = vsel %vm4384_vm0, %v1483_v60, %v1225_v27  ;;  %v1420_v2 = vmul.f32 6.2831855, %v1356_v57 }
 0x13c   : > { %v1094_v5 = vmul.f32 %v4632_v42, %v962_v0  ;;  %v616_v6 = vpop.permute.xlu1 %615  ;;  %3602 = vmatprep.mubr.msk.f32.mxu1 %vm1594_vm1, %v1560_v1 }
 0x13d   : > { %v1357_v7 = vfloor.f32 %v1293_v62  ;;  %v1228_v9 = vadd.f32 %v4639_v46, %v1157_v63  ;;  %v769_v10 = vmul.f32 %v4618_v39, %v616_v6  ;;  %v1484_v8 = vsub.f32 %v1226_v49, %v1420_v2  ;;  %3920 = vmatpush3.bf16.msra.mxu1 %v3917_v45 }
 0x13e   : > { %3922 = vmatprep.subr.bf16.mxu1 %v3921_v61 }
 0x13f   : > { %v1294_v12 = vmul.f32 0.15915494, %v1228_v9  ;;  %v1158_v13 = vadd.f32 %v1094_v5, %v769_v10  ;;  %v966_v15 = vpop.permute.xlu0 %965  ;;  %v1561_v16 = vsel %vm4384_vm0, %v1484_v8, %v1226_v49  ;;  %v1421_v17 = vmul.f32 6.2831855, %v1357_v7 }
 0x140   : > { %v1095_v18 = vmul.f32 %v4632_v42, %v966_v15  ;;  %v621_v19 = vpop.permute.xlu1 %620  ;;  %3603 = vmatmul.mubr.msk.f32.gmra.mrb[6].mxu1 %vm1594_vm1, %v1561_v16 }
 0x141   : > { %v1358_v20 = vfloor.f32 %v1294_v12  ;;  %v1229_v21 = vadd.f32 %v4639_v46, %v1158_v13  ;;  %v770_v22 = vmul.f32 %v4618_v39, %v621_v19  ;;  %v1485_v23 = vsub.f32 %v1227_v58, %v1421_v17  ;;  %3924 = vmatpush3.bf16.msra.mxu1 %v3921_v61 }
 0x142   : > { %3926 = vmatprep.subr.bf16.mxu1 %v3925_v11 }
 0x143   : > { %v1295_v24 = vmul.f32 0.15915494, %v1229_v21  ;;  %v1159_v25 = vadd.f32 %v1095_v18, %v770_v22  ;;  %v970_v26 = vpop.permute.xlu0 %969  ;;  %v1562_v27 = vsel %vm4384_vm0, %v1485_v23, %v1227_v58  ;;  %v1422_v28 = vmul.f32 6.2831855, %v1358_v20 }
 0x144   : > { %v1096_v29 = vmul.f32 %v4632_v42, %v970_v26  ;;  %v626_v30 = vpop.permute.xlu1 %625  ;;  %3605 = vmatprep.mubr.msk.f32.mxu1 %vm1594_vm1, %v1562_v27 }
 0x145   : > { %v1359_v31 = vfloor.f32 %v1295_v24  ;;  %v1230_v32 = vadd.f32 %v4639_v46, %v1159_v25  ;;  %v771_v33 = vmul.f32 %v4618_v39, %v626_v30  ;;  %v1486_v34 = vsub.f32 %v1228_v9, %v1422_v28  ;;  %3928 = vmatpush3.bf16.msra.mxu1 %v3925_v11 }
 0x147   : > { %v1296_v35 = vmul.f32 0.15915494, %v1230_v32  ;;  %v1160_v36 = vadd.f32 %v1096_v29, %v771_v33  ;;  %v974_v37 = vpop.permute.xlu0 %973  ;;  %v1563_v40 = vsel %vm4384_vm0, %v1486_v34, %v1228_v9  ;;  %v1423_v38 = vmul.f32 6.2831855, %v1359_v31 }
 0x148   : > { %v1097_v41 = vmul.f32 %v4632_v42, %v974_v37  ;;  %v631_v49 = vpop.permute.xlu1 %630  ;;  %3606 = vmatmul.mubr.msk.f32.gmra.mrb[8].mxu1 %vm1594_vm1, %v1563_v40 }
 0x149   : > { %v1360_v43 = vfloor.f32 %v1296_v35  ;;  %v1231_v44 = vadd.f32 %v4639_v46, %v1160_v36  ;;  %v772_v45 = vmul.f32 %v4618_v39, %v631_v49  ;;  %v1487_v47 = vsub.f32 %v1229_v21, %v1423_v38 }
 0x14b   : > { %v1297_v48 = vmul.f32 0.15915494, %v1231_v44  ;;  %v1161_v50 = vadd.f32 %v1097_v41, %v772_v45  ;;  %v978_v51 = vpop.permute.xlu0 %977  ;;  %v1564_v52 = vsel %vm4384_vm0, %v1487_v47, %v1229_v21  ;;  %v1424_v53 = vmul.f32 6.2831855, %v1360_v43 }
 0x14c   : > { %v1098_v54 = vmul.f32 %v4632_v42, %v978_v51  ;;  %v636_v55 = vpop.permute.xlu1 %635  ;;  %3608 = vmatprep.mubr.msk.f32.mxu1 %vm1594_vm1, %v1564_v52 }
 0x14d   : > { %v1361_v56 = vfloor.f32 %v1297_v48  ;;  %v1232_v57 = vadd.f32 %v4639_v46, %v1161_v50  ;;  %v773_v58 = vmul.f32 %v4618_v39, %v636_v55  ;;  %v1488_v59 = vsub.f32 %v1230_v32, %v1424_v53 }
 0x14f   : > { %v1298_v60 = vmul.f32 0.15915494, %v1232_v57  ;;  %v1162_v61 = vadd.f32 %v1098_v54, %v773_v58  ;;  %v982_v62 = vpop.permute.xlu0 %981  ;;  %v1565_v63 = vsel %vm4384_vm0, %v1488_v59, %v1230_v32  ;;  %v1425_v0 = vmul.f32 6.2831855, %v1361_v56 }
 0x150   : > { %v1099_v1 = vmul.f32 %v4632_v42, %v982_v62  ;;  %v641_v2 = vpop.permute.xlu1 %640  ;;  %3609 = vmatmul.mubr.msk.f32.gmra.mrb[10].mxu1 %vm1594_vm1, %v1565_v63 }
 0x151   : > { %v1362_v3 = vfloor.f32 %v1298_v60  ;;  %v1233_v4 = vadd.f32 %v4639_v46, %v1162_v61  ;;  %v774_v5 = vmul.f32 %v4618_v39, %v641_v2  ;;  %v1489_v6 = vsub.f32 %v1231_v44, %v1425_v0 }
 0x153   : > { %v1299_v7 = vmul.f32 0.15915494, %v1233_v4  ;;  %v1163_v9 = vadd.f32 %v1099_v1, %v774_v5  ;;  %v986_v10 = vpop.permute.xlu0 %985  ;;  %v1566_v8 = vsel %vm4384_vm0, %v1489_v6, %v1231_v44  ;;  %v1426_v11 = vmul.f32 6.2831855, %v1362_v3 }
 0x154   : > { %v1100_v12 = vmul.f32 %v4632_v42, %v986_v10  ;;  %v646_v13 = vpop.permute.xlu1 %645  ;;  %3611 = vmatprep.mubr.msk.f32.mxu1 %vm1594_vm1, %v1566_v8 }
 0x155   : > { %v1363_v15 = vfloor.f32 %v1299_v7  ;;  %v1234_v16 = vadd.f32 %v4639_v46, %v1163_v9  ;;  %v775_v17 = vmul.f32 %v4618_v39, %v646_v13  ;;  %v1490_v18 = vsub.f32 %v1232_v57, %v1426_v11 }
 0x157   : > { %v1300_v19 = vmul.f32 0.15915494, %v1234_v16  ;;  %v1164_v20 = vadd.f32 %v1100_v12, %v775_v17  ;;  %v990_v21 = vpop.permute.xlu0 %989  ;;  %v1567_v22 = vsel %vm4384_vm0, %v1490_v18, %v1232_v57  ;;  %v1427_v23 = vmul.f32 6.2831855, %v1363_v15 }
 0x158   : > { %v1101_v24 = vmul.f32 %v4632_v42, %v990_v21  ;;  %v651_v25 = vpop.permute.xlu1 %650  ;;  %3612 = vmatmul.mubr.msk.f32.gmra.mrb[12].mxu1 %vm1594_vm1, %v1567_v22 }
 0x159   : > { %v1364_v26 = vfloor.f32 %v1300_v19  ;;  %v1235_v27 = vadd.f32 %v4639_v46, %v1164_v20  ;;  %v776_v28 = vmul.f32 %v4618_v39, %v651_v25  ;;  %v1491_v29 = vsub.f32 %v1233_v4, %v1427_v23 }
 0x15b   : > { %v1301_v30 = vmul.f32 0.15915494, %v1235_v27  ;;  %v1165_v31 = vadd.f32 %v1101_v24, %v776_v28  ;;  %v994_v32 = vpop.permute.xlu0 %993  ;;  %v1568_v33 = vsel %vm4384_vm0, %v1491_v29, %v1233_v4  ;;  %v1428_v34 = vmul.f32 6.2831855, %v1364_v26 }
 0x15c   : > { %v1102_v35 = vmul.f32 %v4632_v42, %v994_v32  ;;  %v656_v36 = vpop.permute.xlu1 %655  ;;  %3614 = vmatprep.mubr.msk.f32.mxu1 %vm1594_vm1, %v1568_v33 }
 0x15d   : > { %v1365_v37 = vfloor.f32 %v1301_v30  ;;  %v1236_v40 = vadd.f32 %v4639_v46, %v1165_v31  ;;  %v777_v38 = vmul.f32 %v4618_v39, %v656_v36  ;;  %v1492_v41 = vsub.f32 %v1234_v16, %v1428_v34 }
 0x15f   : > { %v1302_v49 = vmul.f32 0.15915494, %v1236_v40  ;;  %v1166_v43 = vadd.f32 %v1102_v35, %v777_v38  ;;  %v998_v44 = vpop.permute.xlu0 %997  ;;  %v1569_v45 = vsel %vm4384_vm0, %v1492_v41, %v1234_v16  ;;  %v1429_v47 = vmul.f32 6.2831855, %v1365_v37 }
 0x160   : > { %v1103_v48 = vmul.f32 %v4632_v42, %v998_v44  ;;  %v661_v50 = vpop.permute.xlu1 %660  ;;  %3615 = vmatmul.mubr.msk.f32.gmra.mrb[14].mxu1 %vm1594_vm1, %v1569_v45 }
 0x161   : > { %v1366_v51 = vfloor.f32 %v1302_v49  ;;  %v1237_v52 = vadd.f32 %v4639_v46, %v1166_v43  ;;  %v778_v53 = vmul.f32 %v4618_v39, %v661_v50  ;;  %v1493_v54 = vsub.f32 %v1235_v27, %v1429_v47 }
 0x163   : > { %v1303_v55 = vmul.f32 0.15915494, %v1237_v52  ;;  %v1167_v56 = vadd.f32 %v1103_v48, %v778_v53  ;;  %v1002_v57 = vpop.permute.xlu0 %1001  ;;  %v1570_v58 = vsel %vm4384_vm0, %v1493_v54, %v1235_v27  ;;  %v1430_v59 = vmul.f32 6.2831855, %v1366_v51 }
 0x164   : > { %v1104_v60 = vmul.f32 %v4632_v42, %v1002_v57  ;;  %v666_v61 = vpop.permute.xlu1 %665  ;;  %3617 = vmatprep.mubr.msk.f32.mxu1 %vm1594_vm1, %v1570_v58 }
 0x165   : > { %v1367_v62 = vfloor.f32 %v1303_v55  ;;  %v1238_v63 = vadd.f32 %v4639_v46, %v1167_v56  ;;  %v779_v0 = vmul.f32 %v4618_v39, %v666_v61  ;;  %v1494_v1 = vsub.f32 %v1236_v40, %v1430_v59 }
 0x167   : > { %v1304_v2 = vmul.f32 0.15915494, %v1238_v63  ;;  %v1168_v3 = vadd.f32 %v1104_v60, %v779_v0  ;;  %v1006_v4 = vpop.permute.xlu0 %1005  ;;  %v1571_v5 = vsel %vm4384_vm0, %v1494_v1, %v1236_v40  ;;  %v1431_v6 = vmul.f32 6.2831855, %v1367_v62 }
 0x168   : > { %v1105_v7 = vmul.f32 %v4632_v42, %v1006_v4  ;;  %v671_v9 = vpop.permute.xlu1 %670  ;;  %3618 = vmatmul.mubr.msk.f32.gmra.mrb[16].mxu1 %vm1594_vm1, %v1571_v5 }
 0x169   : > { %v1368_v10 = vfloor.f32 %v1304_v2  ;;  %v1239_v8 = vadd.f32 %v4639_v46, %v1168_v3  ;;  %v780_v11 = vmul.f32 %v4618_v39, %v671_v9  ;;  %v1495_v12 = vsub.f32 %v1237_v52, %v1431_v6 }
 0x16b   : > { %v1305_v13 = vmul.f32 0.15915494, %v1239_v8  ;;  %v1169_v15 = vadd.f32 %v1105_v7, %v780_v11  ;;  %v1010_v16 = vpop.permute.xlu0 %1009  ;;  %v1572_v17 = vsel %vm4384_vm0, %v1495_v12, %v1237_v52  ;;  %v1432_v18 = vmul.f32 6.2831855, %v1368_v10 }
 0x16c   : > { %v1106_v19 = vmul.f32 %v4632_v42, %v1010_v16  ;;  %v676_v20 = vpop.permute.xlu1 %675  ;;  %3620 = vmatprep.mubr.msk.f32.mxu1 %vm1594_vm1, %v1572_v17 }
 0x16d   : > { %v1369_v21 = vfloor.f32 %v1305_v13  ;;  %v1240_v22 = vadd.f32 %v4639_v46, %v1169_v15  ;;  %v781_v23 = vmul.f32 %v4618_v39, %v676_v20  ;;  %v1496_v24 = vsub.f32 %v1238_v63, %v1432_v18 }
 0x16f   : > { %v1306_v25 = vmul.f32 0.15915494, %v1240_v22  ;;  %v1170_v26 = vadd.f32 %v1106_v19, %v781_v23  ;;  %v1014_v27 = vpop.permute.xlu0 %1013  ;;  %v1573_v28 = vsel %vm4384_vm0, %v1496_v24, %v1238_v63  ;;  %v1433_v29 = vmul.f32 6.2831855, %v1369_v21 }
 0x170   : > { %v1107_v30 = vmul.f32 %v4632_v42, %v1014_v27  ;;  %v681_v31 = vpop.permute.xlu1 %680  ;;  %3621 = vmatmul.mubr.msk.f32.gmra.mrb[18].mxu1 %vm1594_vm1, %v1573_v28 }
 0x171   : > { %v1370_v32 = vfloor.f32 %v1306_v25  ;;  %v1241_v33 = vadd.f32 %v4639_v46, %v1170_v26  ;;  %v782_v34 = vmul.f32 %v4618_v39, %v681_v31  ;;  %v1497_v35 = vsub.f32 %v1239_v8, %v1433_v29 }
 0x173   : > { %v1307_v36 = vmul.f32 0.15915494, %v1241_v33  ;;  %v1171_v37 = vadd.f32 %v1107_v30, %v782_v34  ;;  %v1018_v40 = vpop.permute.xlu0 %1017  ;;  %v1574_v38 = vsel %vm4384_vm0, %v1497_v35, %v1239_v8  ;;  %v1434_v41 = vmul.f32 6.2831855, %v1370_v32 }
 0x174   : > { %v1108_v49 = vmul.f32 %v4632_v42, %v1018_v40  ;;  %v686_v43 = vpop.permute.xlu1 %685  ;;  %3623 = vmatprep.mubr.msk.f32.mxu1 %vm1594_vm1, %v1574_v38 }
 0x175   : > { %v1371_v44 = vfloor.f32 %v1307_v36  ;;  %v1242_v45 = vadd.f32 %v4639_v46, %v1171_v37  ;;  %v783_v47 = vmul.f32 %v4618_v39, %v686_v43  ;;  %v1498_v48 = vsub.f32 %v1240_v22, %v1434_v41 }
 0x177   : > { %v1308_v50 = vmul.f32 0.15915494, %v1242_v45  ;;  %v1172_v51 = vadd.f32 %v1108_v49, %v783_v47  ;;  %v1022_v52 = vpop.permute.xlu0 %1021  ;;  %v1575_v53 = vsel %vm4384_vm0, %v1498_v48, %v1240_v22  ;;  %v1435_v54 = vmul.f32 6.2831855, %v1371_v44 }
 0x178   : > { %v1109_v55 = vmul.f32 %v4632_v42, %v1022_v52  ;;  %v691_v56 = vpop.permute.xlu1 %690  ;;  %3624 = vmatmul.mubr.msk.f32.gmra.mrb[20].mxu1 %vm1594_vm1, %v1575_v53 }
 0x179   : > { %v1372_v57 = vfloor.f32 %v1308_v50  ;;  %v1243_v58 = vadd.f32 %v4639_v46, %v1172_v51  ;;  %v784_v59 = vmul.f32 %v4618_v39, %v691_v56  ;;  %v1499_v60 = vsub.f32 %v1241_v33, %v1435_v54 }
 0x17b   : > { %v1309_v61 = vmul.f32 0.15915494, %v1243_v58  ;;  %v1173_v62 = vadd.f32 %v1109_v55, %v784_v59  ;;  %v4806_v63 = vpop.f32.mrb[0].mxu0  ;;  %v1026_v0 = vpop.permute.xlu0 %1025  ;;  %v1576_v1 = vsel %vm4384_vm0, %v1499_v60, %v1241_v33  ;;  %v1436_v2 = vmul.f32 6.2831855, %v1372_v57 }
 0x17c   : > { %v1110_v3 = vmul.f32 %v4632_v42, %v1026_v0  ;;  %v696_v4 = vpop.permute.xlu1 %695  ;;  %v4811_v5 = vpop.f32.mrb[1].mxu0  ;;  %3626 = vmatprep.mubr.msk.f32.mxu1 %vm1594_vm1, %v1576_v1 }
 0x17d   : > { %v1373_v6 = vfloor.f32 %v1309_v61  ;;  %v1244_v7 = vadd.f32 %v4639_v46, %v1173_v62  ;;  %v785_v9 = vmul.f32 %v4618_v39, %v696_v4  ;;  %v1500_v10 = vsub.f32 %v1242_v45, %v1436_v2  ;;  %v4845_v62 = vld [vmem:[%s5258_s4] ss:$0 sm:$0xff] }
 0x17f   : > { %v1310_v8 = vmul.f32 0.15915494, %v1244_v7  ;;  %v1174_v11 = vadd.f32 %v1110_v3, %v785_v9  ;;  %v1030_v12 = vpop.permute.xlu0 %1029  ;;  %v1437_v13 = vmul.f32 6.2831855, %v1373_v6  ;;  %v1577_v17 = vsel %vm4384_vm0, %v1500_v10, %v1242_v45 }
 0x180   : > { %v1111_v15 = vmul.f32 %v4632_v42, %v1030_v12  ;;  %v701_v16 = vpop.permute.xlu1 %700  ;;  %3627 = vmatmul.mubr.msk.f32.gmra.mrb[22].mxu1 %vm1594_vm1, %v1577_v17  ;;  %v1854_v12 = vadd.f32 %v4845_v62, %v4811_v5 }
 0x181   : > { %v1374_v18 = vfloor.f32 %v1310_v8  ;;  %v1245_v19 = vadd.f32 %v4639_v46, %v1174_v11  ;;  %v786_v20 = vmul.f32 %v4618_v39, %v701_v16  ;;  %v1501_v21 = vsub.f32 %v1243_v58, %v1437_v13 }
 0x182   : > { %3978 = vtanh.f32 %v1854_v12 }
 0x183   : > { %v1311_v22 = vmul.f32 0.15915494, %v1245_v19  ;;  %v1175_v23 = vadd.f32 %v1111_v15, %v786_v20  ;;  %v4822_v24 = vpop.f32.mrb[2].mxu0  ;;  %v1034_v25 = vpop.permute.xlu0 %1033  ;;  %v1578_v26 = vsel %vm4384_vm0, %v1501_v21, %v1243_v58  ;;  %v1438_v27 = vmul.f32 6.2831855, %v1374_v18 }
 0x184   : > { %v1112_v28 = vmul.f32 %v4632_v42, %v1034_v25  ;;  %v706_v29 = vpop.permute.xlu1 %705  ;;  %v1863_v30 = vpop.f32.mrb[3].mxu0  ;;  %3629 = vmatprep.mubr.msk.f32.mxu1 %vm1594_vm1, %v1578_v26  ;;  %v1869_v26 = vadd.f32 %v4822_v24, %v4845_v62 }
 0x185   : > { %v1375_v31 = vfloor.f32 %v1311_v22  ;;  %v1246_v32 = vadd.f32 %v4639_v46, %v1175_v23  ;;  %v787_v33 = vmul.f32 %v4618_v39, %v706_v29  ;;  %v1502_v34 = vsub.f32 %v1244_v7, %v1438_v27 }
 0x186   : > { %v1864_v5 = vadd.f32 %v4845_v62, %v1863_v30 }
 0x187   : > { %v1312_v35 = vmul.f32 0.15915494, %v1246_v32  ;;  %v1176_v36 = vadd.f32 %v1112_v28, %v787_v33  ;;  %v1038_v37 = vpop.permute.xlu0 %1037  ;;  %v1439_v40 = vmul.f32 6.2831855, %v1375_v31  ;;  %v1579_v49 = vsel %vm4384_vm0, %v1502_v34, %v1244_v7 }
 0x188   : > { %v1113_v38 = vmul.f32 %v4632_v42, %v1038_v37  ;;  %v711_v41 = vpop.permute.xlu1 %710  ;;  %3630 = vmatmul.mubr.msk.f32.gmra.mrb[24].mxu1 %vm1594_vm1, %v1579_v49 }
 0x189   : > { %v1376_v43 = vfloor.f32 %v1312_v35  ;;  %v1247_v44 = vadd.f32 %v4639_v46, %v1176_v36  ;;  %v788_v45 = vmul.f32 %v4618_v39, %v711_v41  ;;  %v1503_v47 = vsub.f32 %v1245_v19, %v1439_v40 }
 0x18b   : > { %v1313_v48 = vmul.f32 0.15915494, %v1247_v44  ;;  %v1177_v50 = vadd.f32 %v1113_v38, %v788_v45  ;;  %v3553_v51 = vpop.f32.mrb[4].mxu0  ;;  %v1042_v52 = vpop.permute.xlu0 %1041  ;;  %v1580_v53 = vsel %vm4384_vm0, %v1503_v47, %v1245_v19  ;;  %v1440_v54 = vmul.f32 6.2831855, %v1376_v43 }
 0x18c   : > { %v1114_v55 = vmul.f32 %v4632_v42, %v1042_v52  ;;  %v716_v56 = vpop.permute.xlu1 %715  ;;  %v1873_v57 = vpop.f32.mrb[5].mxu0  ;;  %3632 = vmatprep.mubr.msk.f32.mxu1 %vm1594_vm1, %v1580_v53  ;;  %v1859_v19 = vadd.f32 %v4806_v63, %v4845_v62 }
 0x18d   : > { %v1377_v58 = vfloor.f32 %v1313_v48  ;;  %v1248_v59 = vadd.f32 %v4639_v46, %v1177_v50  ;;  %v789_v60 = vmul.f32 %v4618_v39, %v716_v56  ;;  %v1504_v61 = vsub.f32 %v1246_v32, %v1440_v54  ;;  %v3979_v35 = vpop.eup %3978 }
 0x18e   : > { %3980 = vtanh.f32 %v1859_v19 }
 0x18f   : > { %v1314_v0 = vmul.f32 0.15915494, %v1248_v59  ;;  %v1178_v1 = vadd.f32 %v1114_v55, %v789_v60  ;;  %v1046_v2 = vpop.permute.xlu0 %1045  ;;  %v1441_v3 = vmul.f32 6.2831855, %v1377_v58  ;;  %v1581_v7 = vsel %vm4384_vm0, %v1504_v61, %v1246_v32 }
 0x190   : > { %v1115_v4 = vmul.f32 %v4632_v42, %v1046_v2  ;;  %v721_v6 = vpop.permute.xlu1 %720  ;;  %3633 = vmatmul.mubr.msk.f32.gmra.mrb[26].mxu1 %vm1594_vm1, %v1581_v7  ;;  %3982 = vtanh.f32 %v1864_v5  ;;  %v1879_v32 = vadd.f32 %v3553_v51, %v4845_v62 }
 0x191   : > { %v1378_v9 = vfloor.f32 %v1314_v0  ;;  %v1249_v10 = vadd.f32 %v4639_v46, %v1178_v1  ;;  %v790_v8 = vmul.f32 %v4618_v39, %v721_v6  ;;  %v1505_v11 = vsub.f32 %v1247_v44, %v1441_v3 }
 0x192   : > { %3984 = vtanh.f32 %v1869_v26 }
 0x193   : > { %v1315_v13 = vmul.f32 0.15915494, %v1249_v10  ;;  %v1179_v15 = vadd.f32 %v1115_v4, %v790_v8  ;;  %v3556_v16 = vpop.f32.mrb[6].mxu0  ;;  %v1582_v42 = vsel %vm4384_vm0, %v1505_v11, %v1247_v44  ;;  %v1442_v17 = vmul.f32 6.2831855, %v1378_v9 }
 0x194   : > { %v1883_v18 = vpop.f32.mrb[7].mxu0  ;;  %3635 = vmatprep.mubr.msk.f32.mxu1 %vm1594_vm1, %v1582_v42  ;;  %v1889_v36 = vadd.f32 %v3556_v16, %v4845_v62 }
 0x195   : > { %v1379_v39 = vfloor.f32 %v1315_v13  ;;  %v1250_v20 = vadd.f32 %v4639_v46, %v1179_v15  ;;  %v1506_v21 = vsub.f32 %v1248_v59, %v1442_v17  ;;  %v1874_v46 = vadd.f32 %v4845_v62, %v1873_v57 }
 0x196   : > { %v1884_v24 = vadd.f32 %v4845_v62, %v1883_v18 }
 0x197   : > { %v1316_v22 = vmul.f32 0.15915494, %v1250_v20  ;;  %v1583_v23 = vsel %vm4384_vm0, %v1506_v21, %v1248_v59  ;;  %v1443_v25 = vmul.f32 6.2831855, %v1379_v39  ;;  %3986 = vtanh.f32 %v1874_v46 }
 0x198   : > { %3636 = vmatmul.mubr.msk.f32.gmra.mrb[28].mxu1 %vm1594_vm1, %v1583_v23  ;;  %3988 = vtanh.f32 %v1879_v32  ;;  %v3981_v40 = vpop.eup %3980 }
 0x199   : > { %v1380_v27 = vfloor.f32 %v1316_v22  ;;  %v1507_v63 = vsub.f32 %v1249_v10, %v1443_v25  ;;  %3990 = vtanh.f32 %v1884_v24 }
 0x19a   : > { %v3983_v41 = vpop.eup %3982  ;;  %3992 = vtanh.f32 %v1889_v36  ;;  %v2709_v36 = vld [vmem:[%s5261_s7 + $0x8] sm:$0xff] }
 0x19b   : > { %v3559_v28 = vpop.f32.mrb[8].mxu0  ;;  %v1584_v29 = vsel %vm4384_vm0, %v1507_v63, %v1249_v10  ;;  %v1444_v30 = vmul.f32 6.2831855, %v1380_v27 }
 0x19c   : > { %v1893_v31 = vpop.f32.mrb[9].mxu0  ;;  %3638 = vmatprep.mubr.msk.f32.mxu1 %vm1594_vm1, %v1584_v29  ;;  %v1899_v43 = vadd.f32 %v3559_v28, %v4845_v62  ;;  %v3985_v44 = vpop.eup %3984 }
 0x19d   : > { %v1508_v33 = vsub.f32 %v1250_v20, %v1444_v30  ;;  %v1894_v37 = vadd.f32 %v4845_v62, %v1893_v31 }
 0x19f   : > { %v1585_v34 = vsel %vm4384_vm0, %v1508_v33, %v1250_v20  ;;  %3994 = vtanh.f32 %v1894_v37 }
 0x1a0   : > { %3639 = vmatmul.mubr.msk.f32.gmra.mrb[30].mxu1 %vm1594_vm1, %v1585_v34  ;;  %3996 = vtanh.f32 %v1899_v43 }
 0x1a1   : > { %3673 = vmatprep.mubr.f32.mxu1 %v3979_v35  ;;  %v3987_v45 = vpop.eup %3986  ;;  %v2708_v35 = vld [vmem:[%s5261_s7] sm:$0xff] }
 0x1a2   : > { %v3989_v48 = vpop.eup %3988  ;;  %v3929_v37 = vpack.c.bf16 %v2709_v36, %v2708_v35 }
 0x1a3   : > { %v3562_v38 = vpop.f32.mrb[10].mxu0  ;;  %v3991_v51 = vpop.eup %3990 }
 0x1a4   : > { %v1903_v49 = vpop.f32.mrb[11].mxu0  ;;  %3674 = vmatmul.mubr.f32.vlgmr.msra.gmra.mrb[32].mxu1 %v3981_v40  ;;  %v1909_v47 = vadd.f32 %v3562_v38, %v4845_v62  ;;  %v3993_v55 = vpop.eup %3992  ;;  %3930 = vmatprep.subr.bf16.mxu0 %v3929_v37  ;;  %v2710_v38 = vld [vmem:[%s5261_s7 + $0x10] sm:$0xff] }
 0x1a5   : > { %3676 = vmatprep.mubr.f32.mxu1 %v3983_v41  ;;  %v1904_v14 = vadd.f32 %v4845_v62, %v1903_v49  ;;  %3932 = vmatpush3.bf16.msra.mxu0 %v3929_v37  ;;  %v2711_v41 = vld [vmem:[%s5261_s7 + $0x18] sm:$0xff] }
 0x1a6   : > { %v3933_v43 = vpack.c.bf16 %v2711_v41, %v2710_v38 }
 0x1a7   : > { %3998 = vtanh.f32 %v1904_v14 }
 0x1a8   : > { %3677 = vmatmul.mubr.f32.gmra.mrb[34].mxu1 %v3985_v44  ;;  %4000 = vtanh.f32 %v1909_v47  ;;  %3934 = vmatprep.subr.bf16.mxu0 %v3933_v43 }
 0x1a9   : > { %3679 = vmatprep.mubr.f32.mxu1 %v3987_v45  ;;  %v3995_v56 = vpop.eup %3994  ;;  %3936 = vmatpush3.bf16.msra.mxu0 %v3933_v43 }
 0x1aa   : > { %v3997_v57 = vpop.eup %3996 }
 0x1ab   : > { %v3565_v50 = vpop.f32.mrb[12].mxu0 }
 0x1ac   : > { %v1913_v52 = vpop.f32.mrb[13].mxu0  ;;  %3680 = vmatmul.mubr.f32.gmra.mrb[36].mxu1 %v3989_v48  ;;  %v1919_v53 = vadd.f32 %v3565_v50, %v4845_v62  ;;  %v2712_v48 = vld [vmem:[%s5261_s7 + $0x20] sm:$0xff]  ;;  %v2713_v50 = vld [vmem:[%s5261_s7 + $0x28] sm:$0xff] }
 0x1ad   : > { %v1914_v54 = vadd.f32 %v4845_v62, %v1913_v52  ;;  %3682 = vmatprep.mubr.f32.mxu1 %v3991_v51  ;;  %v3937_v51 = vpack.c.bf16 %v2713_v50, %v2712_v48 }
 0x1af   : > { %4002 = vtanh.f32 %v1914_v54  ;;  %3938 = vmatprep.subr.bf16.mxu0 %v3937_v51  ;;  %v2715_v54 = vld [vmem:[%s5261_s7 + $0x38] sm:$0xff] }
 0x1b0   : > { %3683 = vmatmul.mubr.f32.gmra.mrb[38].mxu1 %v3993_v55  ;;  %4004 = vtanh.f32 %v1919_v53  ;;  %3940 = vmatpush3.bf16.msra.mxu0 %v3937_v51  ;;  %v2714_v53 = vld [vmem:[%s5261_s7 + $0x30] sm:$0xff] }
 0x1b1   : > { %3685 = vmatprep.mubr.f32.mxu1 %v3995_v56  ;;  %v3999_v59 = vpop.eup %3998  ;;  %v3941_v56 = vpack.c.bf16 %v2715_v54, %v2714_v53 }
 0x1b2   : > { %v4001_v1 = vpop.eup %4000 }
 0x1b3   : > { %v3568_v58 = vpop.f32.mrb[14].mxu0  ;;  %3942 = vmatprep.subr.bf16.mxu0 %v3941_v56 }
 0x1b4   : > { %v1929_v60 = vadd.f32 %v3568_v58, %v4845_v62  ;;  %v1923_v61 = vpop.f32.mrb[15].mxu0  ;;  %3686 = vmatmul.mubr.f32.gmra.mrb[40].mxu1 %v3997_v57  ;;  %3944 = vmatpush3.bf16.msra.mxu0 %v3941_v56 }
 0x1b5   : > { %v1924_v0 = vadd.f32 %v4845_v62, %v1923_v61  ;;  %3688 = vmatprep.mubr.f32.mxu1 %v3999_v59  ;;  %v2716_v61 = vld [vmem:[%s5261_s7 + $0x40] sm:$0xff] }
 0x1b7   : > { %4006 = vtanh.f32 %v1924_v0  ;;  %v2717_v0 = vld [vmem:[%s5261_s7 + $0x48] sm:$0xff] }
 0x1b8   : > { %4008 = vtanh.f32 %v1929_v60  ;;  %3689 = vmatmul.mubr.f32.gmra.mrb[42].mxu1 %v4001_v1  ;;  %v3945_v1 = vpack.c.bf16 %v2717_v0, %v2716_v61 }
 0x1b9   : > { %v4003_v2 = vpop.eup %4002 }
 0x1ba   : > { %3691 = vmatprep.mubr.f32.mxu1 %v4003_v2  ;;  %v4005_v3 = vpop.eup %4004  ;;  %3946 = vmatprep.subr.bf16.mxu0 %v3945_v1 }
 0x1bb   : > { %v3571_v4 = vpop.f32.mrb[16].mxu0  ;;  %3948 = vmatpush3.bf16.msra.mxu0 %v3945_v1 }
 0x1bc   : > { %v1939_v6 = vadd.f32 %v3571_v4, %v4845_v62  ;;  %v1933_v7 = vpop.f32.mrb[17].mxu0  ;;  %3692 = vmatmul.mubr.f32.gmra.mrb[44].mxu1 %v4005_v3  ;;  %v2718_v3 = vld [vmem:[%s5261_s7 + $0x50] sm:$0xff]  ;;  %v2719_v4 = vld [vmem:[%s5261_s7 + $0x58] sm:$0xff] }
 0x1bd   : > { %v1934_v9 = vadd.f32 %v4845_v62, %v1933_v7  ;;  %v3949_v7 = vpack.c.bf16 %v2719_v4, %v2718_v3 }
 0x1bf   : > { %4010 = vtanh.f32 %v1934_v9  ;;  %3950 = vmatprep.subr.bf16.mxu0 %v3949_v7 }
 0x1c0   : > { %4012 = vtanh.f32 %v1939_v6  ;;  %3952 = vmatpush3.bf16.msra.mxu0 %v3949_v7 }
 0x1c1   : > { %v4007_v10 = vpop.eup %4006 }
 0x1c2   : > { %v4009_v8 = vpop.eup %4008  ;;  %3694 = vmatprep.mubr.f32.mxu1 %v4007_v10 }
 0x1c3   : > { %v3574_v11 = vpop.f32.mrb[18].mxu0  ;;  %3695 = vmatmul.mubr.f32.gmra.mrb[46].mxu1 %v4009_v8 }
 0x1c4   : > { %v1949_v12 = vadd.f32 %v3574_v11, %v4845_v62  ;;  %v1943_v13 = vpop.f32.mrb[19].mxu0 }
 0x1c5   : > { %v1944_v15 = vadd.f32 %v4845_v62, %v1943_v13  ;;  %v2721_v13 = vld [vmem:[%s5261_s7 + $0x68] sm:$0xff] }
 0x1c7   : > { %4014 = vtanh.f32 %v1944_v15 }
 0x1c8   : > { %4016 = vtanh.f32 %v1949_v12  ;;  %v2720_v12 = vld [vmem:[%s5261_s7 + $0x60] sm:$0xff] }
 0x1c9   : > { %v4011_v16 = vpop.eup %4010  ;;  %v3953_v15 = vpack.c.bf16 %v2721_v13, %v2720_v12 }
 0x1ca   : > { %v4013_v42 = vpop.eup %4012  ;;  %3697 = vmatprep.mubr.f32.mxu1 %v4011_v16 }
 0x1cb   : > { %v3577_v17 = vpop.f32.mrb[20].mxu0  ;;  %3698 = vmatmul.mubr.f32.gmra.mrb[48].mxu1 %v4013_v42  ;;  %3954 = vmatprep.subr.bf16.mxu0 %v3953_v15  ;;  %v2722_v42 = vld [vmem:[%s5261_s7 + $0x70] sm:$0xff] }
 0x1cc   : > { %v1959_v18 = vadd.f32 %v3577_v17, %v4845_v62  ;;  %v1953_v19 = vpop.f32.mrb[21].mxu0  ;;  %3956 = vmatpush3.bf16.msra.mxu0 %v3953_v15  ;;  %v2723_v17 = vld [vmem:[%s5261_s7 + $0x78] sm:$0xff] }
 0x1cd   : > { %v1954_v39 = vadd.f32 %v4845_v62, %v1953_v19  ;;  %v3957_v19 = vpack.c.bf16 %v2723_v17, %v2722_v42 }
 0x1cf   : > { %4018 = vtanh.f32 %v1954_v39  ;;  %3958 = vmatprep.subr.bf16.mxu0 %v3957_v19 }
 0x1d0   : > { %4020 = vtanh.f32 %v1959_v18  ;;  %3960 = vmatpush3.bf16.msra.mxu0 %v3957_v19 }
 0x1d1   : > { %v4015_v20 = vpop.eup %4014 }
 0x1d2   : > { %v4017_v21 = vpop.eup %4016  ;;  %3700 = vmatprep.mubr.f32.mxu1 %v4015_v20 }
 0x1d3   : > { %v3580_v5 = vpop.f32.mrb[22].mxu0  ;;  %3701 = vmatmul.mubr.f32.gmra.mrb[50].mxu1 %v4017_v21 }
 0x1d4   : > { %v1969_v22 = vadd.f32 %v3580_v5, %v4845_v62  ;;  %v1963_v23 = vpop.f32.mrb[23].mxu0 }
 0x1d5   : > { %v1964_v25 = vadd.f32 %v4845_v62, %v1963_v23 }
 0x1d7   : > { %4022 = vtanh.f32 %v1964_v25 }
 0x1d8   : > { %4024 = vtanh.f32 %v1969_v22 }
 0x1d9   : > { %v4019_v26 = vpop.eup %4018 }
 0x1da   : > { %v4021_v27 = vpop.eup %4020  ;;  %3703 = vmatprep.mubr.f32.mxu1 %v4019_v26 }
 0x1db   : > { %v3583_v63 = vpop.f32.mrb[24].mxu0  ;;  %3704 = vmatmul.mubr.f32.gmra.mrb[52].mxu1 %v4021_v27 }
 0x1dc   : > { %v1979_v46 = vadd.f32 %v3583_v63, %v4845_v62  ;;  %v1973_v28 = vpop.f32.mrb[25].mxu0 }
 0x1dd   : > { %v1974_v29 = vadd.f32 %v4845_v62, %v1973_v28 }
 0x1df   : > { %4026 = vtanh.f32 %v1974_v29 }
 0x1e0   : > { %4028 = vtanh.f32 %v1979_v46 }
 0x1e1   : > { %v4023_v30 = vpop.eup %4022 }
 0x1e2   : > { %v4025_v31 = vpop.eup %4024  ;;  %3706 = vmatprep.mubr.f32.mxu1 %v4023_v30 }
 0x1e3   : > { %v3586_v32 = vpop.f32.mrb[26].mxu0  ;;  %3707 = vmatmul.mubr.f32.gmra.mrb[54].mxu1 %v4025_v31 }
 0x1e4   : > { %v1989_v33 = vadd.f32 %v3586_v32, %v4845_v62  ;;  %v1983_v24 = vpop.f32.mrb[27].mxu0 }
 0x1e5   : > { %v1984_v34 = vadd.f32 %v4845_v62, %v1983_v24 }
 0x1e7   : > { %4030 = vtanh.f32 %v1984_v34 }
 0x1e8   : > { %4032 = vtanh.f32 %v1989_v33 }
 0x1e9   : > { %v4027_v40 = vpop.eup %4026 }
 0x1ea   : > { %v4029_v49 = vpop.eup %4028  ;;  %3709 = vmatprep.mubr.f32.mxu1 %v4027_v40 }
 0x1eb   : > { %v3589_v14 = vpop.f32.mrb[28].mxu0  ;;  %3710 = vmatmul.mubr.f32.gmra.mrb[56].mxu1 %v4029_v49 }
 0x1ec   : > { %v1999_v44 = vadd.f32 %v3589_v14, %v4845_v62  ;;  %v1993_v45 = vpop.f32.mrb[29].mxu0 }
 0x1ed   : > { %v1994_v47 = vadd.f32 %v4845_v62, %v1993_v45 }
 0x1ef   : > { %4034 = vtanh.f32 %v1994_v47 }
 0x1f0   : > { %4036 = vtanh.f32 %v1999_v44 }
 0x1f1   : > { %v4031_v52 = vpop.eup %4030 }
 0x1f2   : > { %v4033_v55 = vpop.eup %4032  ;;  %3712 = vmatprep.mubr.f32.mxu1 %v4031_v52 }
 0x1f3   : > { %v3592_v57 = vpop.f32.mrb[30].mxu0  ;;  %3713 = vmatmul.mubr.f32.gmra.mrb[58].mxu1 %v4033_v55 }
 0x1f4   : > { %v2009_v58 = vadd.f32 %v3592_v57, %v4845_v62  ;;  %v2003_v59 = vpop.f32.mrb[31].mxu0 }
 0x1f5   : > { %v2004_v60 = vadd.f32 %v4845_v62, %v2003_v59 }
 0x1f7   : > { %4038 = vtanh.f32 %v2004_v60 }
 0x1f8   : > { %4040 = vtanh.f32 %v2009_v58 }
 0x1f9   : > { %v4035_v2 = vpop.eup %4034 }
 0x1fa   : > { %v4037_v6 = vpop.eup %4036  ;;  %3715 = vmatprep.mubr.f32.mxu1 %v4035_v2 }
 0x1fb   : > { %v3595_v9 = vpop.f32.mrb[0].mxu1  ;;  %3716 = vmatmul.mubr.f32.gmra.mrb[60].mxu1 %v4037_v6 }
 0x1fc   : > { %v2019_v10 = vadd.f32 %v3595_v9, %v4845_v62  ;;  %v2013_v8 = vpop.f32.mrb[1].mxu1 }
 0x1fd   : > { %v2014_v11 = vadd.f32 %v4845_v62, %v2013_v8 }
 0x1ff   : > { %4042 = vtanh.f32 %v2014_v11 }
 0x200   : > { %4044 = vtanh.f32 %v2019_v10 }
 0x201   : > { %v4039_v16 = vpop.eup %4038 }
 0x202   : > { %v4041_v18 = vpop.eup %4040  ;;  %3718 = vmatprep.mubr.f32.mxu1 %v4039_v16 }
 0x203   : > { %v3598_v39 = vpop.f32.mrb[2].mxu1  ;;  %3719 = vmatmul.mubr.f32.gmra.mrb[62].mxu1 %v4041_v18 }
 0x204   : > { %v2029_v20 = vadd.f32 %v3598_v39, %v4845_v62  ;;  %v2023_v21 = vpop.f32.mrb[3].mxu1 }
 0x205   : > { %v2024_v5 = vadd.f32 %v4845_v62, %v2023_v21 }
 0x207   : > { %4046 = vtanh.f32 %v2024_v5 }
 0x208   : > { %4048 = vtanh.f32 %v2029_v20 }
 0x209   : > { %v4043_v22 = vpop.eup %4042 }
 0x20a   : > { %v4045_v23 = vpop.eup %4044  ;;  %3721 = vmatprep.mubr.f32.mxu1 %v4043_v22 }
 0x20b   : > { %v3601_v25 = vpop.f32.mrb[4].mxu1  ;;  %3722 = vmatmul.mubr.f32.gmra.mrb[64].mxu1 %v4045_v23 }
 0x20c   : > { %v2039_v26 = vadd.f32 %v3601_v25, %v4845_v62  ;;  %v2033_v27 = vpop.f32.mrb[5].mxu1 }
 0x20d   : > { %v2034_v63 = vadd.f32 %v4845_v62, %v2033_v27 }
 0x20f   : > { %4050 = vtanh.f32 %v2034_v63 }
 0x210   : > { %4052 = vtanh.f32 %v2039_v26 }
 0x211   : > { %v4047_v46 = vpop.eup %4046 }
 0x212   : > { %v4049_v28 = vpop.eup %4048  ;;  %3724 = vmatprep.mubr.f32.mxu1 %v4047_v46 }
 0x213   : > { %v3604_v29 = vpop.f32.mrb[6].mxu1  ;;  %3725 = vmatmul.mubr.f32.gmra.mrb[66].mxu1 %v4049_v28 }
 0x214   : > { %v2049_v30 = vadd.f32 %v3604_v29, %v4845_v62  ;;  %v2043_v31 = vpop.f32.mrb[7].mxu1 }
 0x215   : > { %v2044_v32 = vadd.f32 %v4845_v62, %v2043_v31 }
 0x217   : > { %4054 = vtanh.f32 %v2044_v32 }
 0x218   : > { %4056 = vtanh.f32 %v2049_v30 }
 0x219   : > { %v4051_v33 = vpop.eup %4050 }
 0x21a   : > { %v4053_v24 = vpop.eup %4052  ;;  %3727 = vmatprep.mubr.f32.mxu1 %v4051_v33 }
 0x21b   : > { %v3607_v34 = vpop.f32.mrb[8].mxu1  ;;  %3728 = vmatmul.mubr.f32.gmra.mrb[68].mxu1 %v4053_v24 }
 0x21c   : > { %v2059_v35 = vadd.f32 %v3607_v34, %v4845_v62  ;;  %v2053_v36 = vpop.f32.mrb[9].mxu1 }
 0x21d   : > { %v2054_v37 = vadd.f32 %v4845_v62, %v2053_v36 }
 0x21f   : > { %4058 = vtanh.f32 %v2054_v37 }
 0x220   : > { %4060 = vtanh.f32 %v2059_v35 }
 0x221   : > { %v4055_v40 = vpop.eup %4054 }
 0x222   : > { %v4057_v38 = vpop.eup %4056  ;;  %3730 = vmatprep.mubr.f32.mxu1 %v4055_v40 }
 0x223   : > { %v3610_v41 = vpop.f32.mrb[10].mxu1  ;;  %3731 = vmatmul.mubr.f32.gmra.mrb[70].mxu1 %v4057_v38 }
 0x224   : > { %v2069_v49 = vadd.f32 %v3610_v41, %v4845_v62  ;;  %v2063_v43 = vpop.f32.mrb[11].mxu1 }
 0x225   : > { %v2064_v14 = vadd.f32 %v4845_v62, %v2063_v43 }
 0x227   : > { %4062 = vtanh.f32 %v2064_v14 }
 0x228   : > { %4064 = vtanh.f32 %v2069_v49  ;;  %v4984_v49 = vld [vmem:[%s5260_s6] ss:$0 sm:$0xff] }
 0x229   : > { %v4059_v44 = vpop.eup %4058 }
 0x22a   : > { %v4061_v45 = vpop.eup %4060  ;;  %3733 = vmatprep.mubr.f32.mxu1 %v4059_v44 }
 0x22b   : > { %v3613_v47 = vpop.f32.mrb[12].mxu1  ;;  %3734 = vmatmul.mubr.f32.gmra.mrb[72].mxu1 %v4061_v45 }
 0x22c   : > { %v2079_v48 = vadd.f32 %v3613_v47, %v4845_v62  ;;  %v2073_v50 = vpop.f32.mrb[13].mxu1 }
 0x22d   : > { %v2074_v51 = vadd.f32 %v4845_v62, %v2073_v50 }
 0x22f   : > { %4066 = vtanh.f32 %v2074_v51 }
 0x230   : > { %4068 = vtanh.f32 %v2079_v48 }
 0x231   : > { %v4063_v52 = vpop.eup %4062 }
 0x232   : > { %v4065_v53 = vpop.eup %4064  ;;  %3736 = vmatprep.mubr.f32.mxu1 %v4063_v52 }
 0x233   : > { %v3616_v54 = vpop.f32.mrb[14].mxu1  ;;  %3737 = vmatmul.mubr.f32.gmra.mrb[74].mxu1 %v4065_v53 }
 0x234   : > { %v2089_v55 = vadd.f32 %v3616_v54, %v4845_v62  ;;  %v2083_v56 = vpop.f32.mrb[15].mxu1 }
 0x235   : > { %v2084_v57 = vadd.f32 %v4845_v62, %v2083_v56 }
 0x237   : > { %4070 = vtanh.f32 %v2084_v57 }
 0x238   : > { %4072 = vtanh.f32 %v2089_v55 }
 0x239   : > { %v4067_v58 = vpop.eup %4066 }
 0x23a   : > { %v4069_v59 = vpop.eup %4068  ;;  %3739 = vmatprep.mubr.f32.mxu1 %v4067_v58 }
 0x23b   : > { %v3619_v60 = vpop.f32.mrb[16].mxu1  ;;  %3740 = vmatmul.mubr.f32.gmra.mrb[76].mxu1 %v4069_v59 }
 0x23c   : > { %v2099_v61 = vadd.f32 %v3619_v60, %v4845_v62  ;;  %v2093_v0 = vpop.f32.mrb[17].mxu1 }
 0x23d   : > { %v2094_v1 = vadd.f32 %v4845_v62, %v2093_v0 }
 0x23f   : > { %4074 = vtanh.f32 %v2094_v1 }
 0x240   : > { %4076 = vtanh.f32 %v2099_v61 }
 0x241   : > { %v4071_v2 = vpop.eup %4070 }
 0x242   : > { %v4073_v3 = vpop.eup %4072  ;;  %3742 = vmatprep.mubr.f32.mxu1 %v4071_v2 }
 0x243   : > { %v3622_v4 = vpop.f32.mrb[18].mxu1  ;;  %3743 = vmatmul.mubr.f32.gmra.mrb[78].mxu1 %v4073_v3 }
 0x244   : > { %v2109_v6 = vadd.f32 %v3622_v4, %v4845_v62  ;;  %v2103_v7 = vpop.f32.mrb[19].mxu1 }
 0x245   : > { %v2104_v9 = vadd.f32 %v4845_v62, %v2103_v7 }
 0x247   : > { %4078 = vtanh.f32 %v2104_v9 }
 0x248   : > { %4080 = vtanh.f32 %v2109_v6 }
 0x249   : > { %v4075_v10 = vpop.eup %4074 }
 0x24a   : > { %v4077_v8 = vpop.eup %4076  ;;  %3745 = vmatprep.mubr.f32.mxu1 %v4075_v10 }
 0x24b   : > { %v3625_v11 = vpop.f32.mrb[20].mxu1  ;;  %3746 = vmatmul.mubr.f32.gmra.mrb[80].mxu1 %v4077_v8 }
 0x24c   : > { %v2119_v12 = vadd.f32 %v3625_v11, %v4845_v62  ;;  %v2113_v13 = vpop.f32.mrb[21].mxu1 }
 0x24d   : > { %v2114_v15 = vadd.f32 %v4845_v62, %v2113_v13 }
 0x24f   : > { %4082 = vtanh.f32 %v2114_v15 }
 0x250   : > { %4084 = vtanh.f32 %v2119_v12 }
 0x251   : > { %v4079_v16 = vpop.eup %4078 }
 0x252   : > { %v4081_v42 = vpop.eup %4080  ;;  %3748 = vmatprep.mubr.f32.mxu1 %v4079_v16 }
 0x253   : > { %3749 = vmatmul.mubr.f32.gmra.mrb[82].mxu1 %v4081_v42  ;;  %v3628_v17 = vpop.f32.mrb[22].mxu1 }
 0x254   : > { %v2129_v18 = vadd.f32 %v3628_v17, %v4845_v62  ;;  %v2123_v19 = vpop.f32.mrb[23].mxu1 }
 0x255   : > { %v2124_v39 = vadd.f32 %v4845_v62, %v2123_v19 }
 0x257   : > { %4086 = vtanh.f32 %v2124_v39 }
 0x258   : > { %4088 = vtanh.f32 %v2129_v18 }
 0x259   : > { %v4083_v20 = vpop.eup %4082 }
 0x25a   : > { %v4085_v21 = vpop.eup %4084  ;;  %3751 = vmatprep.mubr.f32.mxu1 %v4083_v20 }
 0x25b   : > { %3752 = vmatmul.mubr.f32.gmra.mrb[84].mxu1 %v4085_v21  ;;  %v3631_v5 = vpop.f32.mrb[24].mxu1 }
 0x25c   : > { %v2139_v22 = vadd.f32 %v3631_v5, %v4845_v62  ;;  %v2133_v23 = vpop.f32.mrb[25].mxu1 }
 0x25d   : > { %v2134_v25 = vadd.f32 %v4845_v62, %v2133_v23 }
 0x25f   : > { %4090 = vtanh.f32 %v2134_v25 }
 0x260   : > { %4092 = vtanh.f32 %v2139_v22 }
 0x261   : > { %v4087_v26 = vpop.eup %4086 }
 0x262   : > { %v4089_v27 = vpop.eup %4088  ;;  %3754 = vmatprep.mubr.f32.mxu1 %v4087_v26 }
 0x263   : > { %v3634_v63 = vpop.f32.mrb[26].mxu1  ;;  %3755 = vmatmul.mubr.f32.gmra.mrb[86].mxu1 %v4089_v27 }
 0x264   : > { %v2149_v46 = vadd.f32 %v3634_v63, %v4845_v62  ;;  %v2143_v28 = vpop.f32.mrb[27].mxu1 }
 0x265   : > { %v2144_v29 = vadd.f32 %v4845_v62, %v2143_v28 }
 0x267   : > { %4094 = vtanh.f32 %v2144_v29 }
 0x268   : > { %4096 = vtanh.f32 %v2149_v46 }
 0x269   : > { %v4091_v30 = vpop.eup %4090 }
 0x26a   : > { %v4093_v31 = vpop.eup %4092  ;;  %3757 = vmatprep.mubr.f32.mxu1 %v4091_v30 }
 0x26b   : > { %v3637_v32 = vpop.f32.mrb[28].mxu1  ;;  %3758 = vmatmul.mubr.f32.gmra.mrb[88].mxu1 %v4093_v31 }
 0x26c   : > { %v2159_v33 = vadd.f32 %v3637_v32, %v4845_v62  ;;  %v2153_v24 = vpop.f32.mrb[29].mxu1 }
 0x26d   : > { %v2154_v34 = vadd.f32 %v4845_v62, %v2153_v24 }
 0x26f   : > { %4098 = vtanh.f32 %v2154_v34 }
 0x270   : > { %4100 = vtanh.f32 %v2159_v33 }
 0x271   : > { %v4095_v35 = vpop.eup %4094 }
 0x272   : > { %v4097_v36 = vpop.eup %4096  ;;  %3760 = vmatprep.mubr.f32.mxu1 %v4095_v35 }
 0x273   : > { %v3640_v37 = vpop.f32.mrb[30].mxu1  ;;  %3761 = vmatmul.mubr.f32.gmra.mrb[90].mxu1 %v4097_v36 }
 0x274   : > { %v2169_v40 = vadd.f32 %v3640_v37, %v4845_v62  ;;  %v2163_v38 = vpop.f32.mrb[31].mxu1 }
 0x275   : > { %v2164_v41 = vadd.f32 %v4845_v62, %v2163_v38 }
 0x277   : > { %4102 = vtanh.f32 %v2164_v41  ;;  %v3675_v43 = vpop.f32.mrb[32].mxu1 }
 0x278   : > { %4104 = vtanh.f32 %v2169_v40  ;;  %v2331_v14 = vadd.f32 %v3675_v43, %v4984_v49  ;;  %v2325_v44 = vpop.f32.mrb[33].mxu1 }
 0x279   : > { %v4099_v45 = vpop.eup %4098  ;;  %v2326_v47 = vadd.f32 %v4984_v49, %v2325_v44 }
 0x27a   : > { %v4101_v48 = vpop.eup %4100  ;;  %3763 = vmatprep.mubr.f32.mxu1 %v4099_v45 }
 0x27b   : > { %4106 = vtanh.f32 %v2326_v47  ;;  %v3678_v50 = vpop.f32.mrb[34].mxu1  ;;  %3764 = vmatmul.mubr.f32.gmra.mrb[92].mxu1 %v4101_v48 }
 0x27c   : > { %4108 = vtanh.f32 %v2331_v14  ;;  %v2341_v62 = vadd.f32 %v3678_v50, %v4984_v49  ;;  %v2335_v51 = vpop.f32.mrb[35].mxu1 }
 0x27d   : > { %v2336_v52 = vadd.f32 %v4984_v49, %v2335_v51 }
 0x27f   : > { %4110 = vtanh.f32 %v2336_v52  ;;  %v3681_v53 = vpop.f32.mrb[36].mxu1 }
 0x280   : > { %4112 = vtanh.f32 %v2341_v62  ;;  %v2351_v54 = vadd.f32 %v3681_v53, %v4984_v49  ;;  %v2345_v55 = vpop.f32.mrb[37].mxu1 }
 0x281   : > { %v4103_v56 = vpop.eup %4102  ;;  %v2346_v57 = vadd.f32 %v4984_v49, %v2345_v55 }
 0x282   : > { %v4105_v58 = vpop.eup %4104  ;;  %3766 = vmatprep.mubr.f32.mxu1 %v4103_v56 }
 0x283   : > { %4114 = vtanh.f32 %v2346_v57  ;;  %v3684_v59 = vpop.f32.mrb[38].mxu1  ;;  %3767 = vmatmul.mubr.f32.gmra.mrb[94].mxu1 %v4105_v58 }
 0x284   : > { %4116 = vtanh.f32 %v2351_v54  ;;  %v2361_v60 = vadd.f32 %v3684_v59, %v4984_v49  ;;  %v2355_v61 = vpop.f32.mrb[39].mxu1 }
 0x285   : > { %v4107_v0 = vpop.eup %4106  ;;  %v2356_v1 = vadd.f32 %v4984_v49, %v2355_v61 }
 0x286   : > { %v4109_v2 = vpop.eup %4108  ;;  %3801 = vmatprep.mubr.f32.mxu0 %v4107_v0 }
 0x287   : > { %4118 = vtanh.f32 %v2356_v1  ;;  %v3687_v3 = vpop.f32.mrb[40].mxu1  ;;  %3802 = vmatmul.mubr.f32.vlgmr.msra.gmra.mrb[32].mxu0 %v4109_v2 }
 0x288   : > { %4120 = vtanh.f32 %v2361_v60  ;;  %v2371_v4 = vadd.f32 %v3687_v3, %v4984_v49  ;;  %v2365_v6 = vpop.f32.mrb[41].mxu1 }
 0x289   : > { %v4111_v7 = vpop.eup %4110  ;;  %v2366_v9 = vadd.f32 %v4984_v49, %v2365_v6 }
 0x28a   : > { %v4113_v10 = vpop.eup %4112  ;;  %3804 = vmatprep.mubr.f32.mxu0 %v4111_v7 }
 0x28b   : > { %4122 = vtanh.f32 %v2366_v9  ;;  %v3690_v8 = vpop.f32.mrb[42].mxu1  ;;  %3805 = vmatmul.mubr.f32.gmra.mrb[34].mxu0 %v4113_v10 }
 0x28c   : > { %4124 = vtanh.f32 %v2371_v4  ;;  %v2381_v11 = vadd.f32 %v3690_v8, %v4984_v49  ;;  %v2375_v12 = vpop.f32.mrb[43].mxu1 }
 0x28d   : > { %v4115_v13 = vpop.eup %4114  ;;  %v2376_v15 = vadd.f32 %v4984_v49, %v2375_v12 }
 0x28e   : > { %v4117_v16 = vpop.eup %4116  ;;  %3807 = vmatprep.mubr.f32.mxu0 %v4115_v13 }
 0x28f   : > { %4126 = vtanh.f32 %v2376_v15  ;;  %v3693_v42 = vpop.f32.mrb[44].mxu1  ;;  %3808 = vmatmul.mubr.f32.gmra.mrb[36].mxu0 %v4117_v16 }
 0x290   : > { %4128 = vtanh.f32 %v2381_v11  ;;  %v2391_v17 = vadd.f32 %v3693_v42, %v4984_v49  ;;  %v2385_v18 = vpop.f32.mrb[45].mxu1 }
 0x291   : > { %v4119_v19 = vpop.eup %4118  ;;  %v2386_v39 = vadd.f32 %v4984_v49, %v2385_v18 }
 0x292   : > { %v4121_v20 = vpop.eup %4120  ;;  %3810 = vmatprep.mubr.f32.mxu0 %v4119_v19 }
 0x293   : > { %4130 = vtanh.f32 %v2386_v39  ;;  %3811 = vmatmul.mubr.f32.gmra.mrb[38].mxu0 %v4121_v20 }
 0x294   : > { %4132 = vtanh.f32 %v2391_v17 }
 0x295   : > { %v4123_v21 = vpop.eup %4122 }
 0x296   : > { %v4125_v5 = vpop.eup %4124  ;;  %v3696_v22 = vpop.f32.mrb[46].mxu1  ;;  %3813 = vmatprep.mubr.f32.mxu0 %v4123_v21 }
 0x297   : > { %v2401_v23 = vadd.f32 %v3696_v22, %v4984_v49  ;;  %v2395_v25 = vpop.f32.mrb[47].mxu1  ;;  %3814 = vmatmul.mubr.f32.gmra.mrb[40].mxu0 %v4125_v5 }
 0x298   : > { %v2396_v26 = vadd.f32 %v4984_v49, %v2395_v25 }
 0x299   : > { %v4127_v27 = vpop.eup %4126 }
 0x29a   : > { %v4129_v63 = vpop.eup %4128  ;;  %4134 = vtanh.f32 %v2396_v26  ;;  %3816 = vmatprep.mubr.f32.mxu0 %v4127_v27 }
 0x29b   : > { %4136 = vtanh.f32 %v2401_v23  ;;  %3817 = vmatmul.mubr.f32.gmra.mrb[42].mxu0 %v4129_v63 }
 0x29d   : > { %v4131_v46 = vpop.eup %4130 }
 0x29e   : > { %v4133_v28 = vpop.eup %4132  ;;  %v3699_v29 = vpop.f32.mrb[48].mxu1  ;;  %3819 = vmatprep.mubr.f32.mxu0 %v4131_v46 }
 0x29f   : > { %v2411_v30 = vadd.f32 %v3699_v29, %v4984_v49  ;;  %v2405_v31 = vpop.f32.mrb[49].mxu1  ;;  %3820 = vmatmul.mubr.f32.gmra.mrb[44].mxu0 %v4133_v28 }
 0x2a0   : > { %v2406_v32 = vadd.f32 %v4984_v49, %v2405_v31 }
 0x2a2   : > { %4138 = vtanh.f32 %v2406_v32 }
 0x2a3   : > { %4140 = vtanh.f32 %v2411_v30 }
 0x2a4   : > { %v4135_v33 = vpop.eup %4134 }
 0x2a5   : > { %v4137_v24 = vpop.eup %4136  ;;  %3822 = vmatprep.mubr.f32.mxu0 %v4135_v33 }
 0x2a6   : > { %v3702_v34 = vpop.f32.mrb[50].mxu1  ;;  %3823 = vmatmul.mubr.f32.gmra.mrb[46].mxu0 %v4137_v24 }
 0x2a7   : > { %v2421_v35 = vadd.f32 %v3702_v34, %v4984_v49  ;;  %v2415_v36 = vpop.f32.mrb[51].mxu1 }
 0x2a8   : > { %v2416_v37 = vadd.f32 %v4984_v49, %v2415_v36 }
 0x2aa   : > { %4142 = vtanh.f32 %v2416_v37 }
 0x2ab   : > { %4144 = vtanh.f32 %v2421_v35 }
 0x2ac   : > { %v4139_v40 = vpop.eup %4138 }
 0x2ad   : > { %v4141_v38 = vpop.eup %4140  ;;  %3825 = vmatprep.mubr.f32.mxu0 %v4139_v40 }
 0x2ae   : > { %v3705_v41 = vpop.f32.mrb[52].mxu1  ;;  %3826 = vmatmul.mubr.f32.gmra.mrb[48].mxu0 %v4141_v38 }
 0x2af   : > { %v2431_v43 = vadd.f32 %v3705_v41, %v4984_v49  ;;  %v2425_v14 = vpop.f32.mrb[53].mxu1 }
 0x2b0   : > { %v2426_v44 = vadd.f32 %v4984_v49, %v2425_v14 }
 0x2b2   : > { %4146 = vtanh.f32 %v2426_v44 }
 0x2b3   : > { %4148 = vtanh.f32 %v2431_v43 }
 0x2b4   : > { %v4143_v45 = vpop.eup %4142 }
 0x2b5   : > { %v4145_v47 = vpop.eup %4144  ;;  %3828 = vmatprep.mubr.f32.mxu0 %v4143_v45 }
 0x2b6   : > { %v3708_v48 = vpop.f32.mrb[54].mxu1  ;;  %3829 = vmatmul.mubr.f32.gmra.mrb[50].mxu0 %v4145_v47 }
 0x2b7   : > { %v2441_v50 = vadd.f32 %v3708_v48, %v4984_v49  ;;  %v2435_v62 = vpop.f32.mrb[55].mxu1 }
 0x2b8   : > { %v2436_v51 = vadd.f32 %v4984_v49, %v2435_v62 }
 0x2ba   : > { %4150 = vtanh.f32 %v2436_v51 }
 0x2bb   : > { %4152 = vtanh.f32 %v2441_v50 }
 0x2bc   : > { %v4147_v52 = vpop.eup %4146 }
 0x2bd   : > { %v4149_v53 = vpop.eup %4148  ;;  %3831 = vmatprep.mubr.f32.mxu0 %v4147_v52 }
 0x2be   : > { %v3711_v54 = vpop.f32.mrb[56].mxu1  ;;  %3832 = vmatmul.mubr.f32.gmra.mrb[52].mxu0 %v4149_v53 }
 0x2bf   : > { %v2451_v55 = vadd.f32 %v3711_v54, %v4984_v49  ;;  %v2445_v56 = vpop.f32.mrb[57].mxu1 }
 0x2c0   : > { %v2446_v57 = vadd.f32 %v4984_v49, %v2445_v56 }
 0x2c2   : > { %4154 = vtanh.f32 %v2446_v57 }
 0x2c3   : > { %4156 = vtanh.f32 %v2451_v55 }
 0x2c4   : > { %v4151_v58 = vpop.eup %4150 }
 0x2c5   : > { %v4153_v59 = vpop.eup %4152  ;;  %3834 = vmatprep.mubr.f32.mxu0 %v4151_v58 }
 0x2c6   : > { %v3714_v60 = vpop.f32.mrb[58].mxu1  ;;  %3835 = vmatmul.mubr.f32.gmra.mrb[54].mxu0 %v4153_v59 }
 0x2c7   : > { %v2461_v61 = vadd.f32 %v3714_v60, %v4984_v49  ;;  %v2455_v0 = vpop.f32.mrb[59].mxu1 }
 0x2c8   : > { %v2456_v1 = vadd.f32 %v4984_v49, %v2455_v0 }
 0x2ca   : > { %4158 = vtanh.f32 %v2456_v1 }
 0x2cb   : > { %4160 = vtanh.f32 %v2461_v61 }
 0x2cc   : > { %v4155_v2 = vpop.eup %4154 }
 0x2cd   : > { %v4157_v3 = vpop.eup %4156  ;;  %3837 = vmatprep.mubr.f32.mxu0 %v4155_v2 }
 0x2ce   : > { %v3717_v4 = vpop.f32.mrb[60].mxu1  ;;  %3838 = vmatmul.mubr.f32.gmra.mrb[56].mxu0 %v4157_v3 }
 0x2cf   : > { %v2471_v6 = vadd.f32 %v3717_v4, %v4984_v49  ;;  %v2465_v7 = vpop.f32.mrb[61].mxu1 }
 0x2d0   : > { %v2466_v9 = vadd.f32 %v4984_v49, %v2465_v7 }
 0x2d2   : > { %4162 = vtanh.f32 %v2466_v9 }
 0x2d3   : > { %4164 = vtanh.f32 %v2471_v6 }
 0x2d4   : > { %v4159_v10 = vpop.eup %4158 }
 0x2d5   : > { %v4161_v8 = vpop.eup %4160  ;;  %3840 = vmatprep.mubr.f32.mxu0 %v4159_v10 }
 0x2d6   : > { %v3720_v11 = vpop.f32.mrb[62].mxu1  ;;  %3841 = vmatmul.mubr.f32.gmra.mrb[58].mxu0 %v4161_v8 }
 0x2d7   : > { %v2481_v12 = vadd.f32 %v3720_v11, %v4984_v49  ;;  %v2475_v13 = vpop.f32.mrb[63].mxu1 }
 0x2d8   : > { %v2476_v15 = vadd.f32 %v4984_v49, %v2475_v13 }
 0x2da   : > { %4166 = vtanh.f32 %v2476_v15 }
 0x2db   : > { %4168 = vtanh.f32 %v2481_v12 }
 0x2dc   : > { %v4163_v16 = vpop.eup %4162 }
 0x2dd   : > { %v4165_v42 = vpop.eup %4164  ;;  %3843 = vmatprep.mubr.f32.mxu0 %v4163_v16 }
 0x2de   : > { %v3723_v17 = vpop.f32.mrb[64].mxu1  ;;  %3844 = vmatmul.mubr.f32.gmra.mrb[60].mxu0 %v4165_v42 }
 0x2df   : > { %v2491_v18 = vadd.f32 %v3723_v17, %v4984_v49  ;;  %v2485_v19 = vpop.f32.mrb[65].mxu1 }
 0x2e0   : > { %v2486_v39 = vadd.f32 %v4984_v49, %v2485_v19 }
 0x2e2   : > { %4170 = vtanh.f32 %v2486_v39 }
 0x2e3   : > { %4172 = vtanh.f32 %v2491_v18 }
 0x2e4   : > { %v4167_v20 = vpop.eup %4166 }
 0x2e5   : > { %v4169_v21 = vpop.eup %4168  ;;  %3846 = vmatprep.mubr.f32.mxu0 %v4167_v20 }
 0x2e6   : > { %v3726_v5 = vpop.f32.mrb[66].mxu1  ;;  %3847 = vmatmul.mubr.f32.gmra.mrb[62].mxu0 %v4169_v21 }
 0x2e7   : > { %v2501_v22 = vadd.f32 %v3726_v5, %v4984_v49  ;;  %v2495_v23 = vpop.f32.mrb[67].mxu1 }
 0x2e8   : > { %v2496_v25 = vadd.f32 %v4984_v49, %v2495_v23 }
 0x2ea   : > { %4174 = vtanh.f32 %v2496_v25 }
 0x2eb   : > { %4176 = vtanh.f32 %v2501_v22 }
 0x2ec   : > { %v4171_v26 = vpop.eup %4170 }
 0x2ed   : > { %v4173_v27 = vpop.eup %4172  ;;  %3849 = vmatprep.mubr.f32.mxu0 %v4171_v26 }
 0x2ee   : > { %v3729_v63 = vpop.f32.mrb[68].mxu1  ;;  %3850 = vmatmul.mubr.f32.gmra.mrb[64].mxu0 %v4173_v27 }
 0x2ef   : > { %v2511_v46 = vadd.f32 %v3729_v63, %v4984_v49  ;;  %v2505_v28 = vpop.f32.mrb[69].mxu1 }
 0x2f0   : > { %v2506_v29 = vadd.f32 %v4984_v49, %v2505_v28 }
 0x2f2   : > { %4178 = vtanh.f32 %v2506_v29 }
 0x2f3   : > { %4180 = vtanh.f32 %v2511_v46 }
 0x2f4   : > { %v4175_v30 = vpop.eup %4174 }
 0x2f5   : > { %v4177_v31 = vpop.eup %4176  ;;  %3852 = vmatprep.mubr.f32.mxu0 %v4175_v30 }
 0x2f6   : > { %v3732_v32 = vpop.f32.mrb[70].mxu1  ;;  %3853 = vmatmul.mubr.f32.gmra.mrb[66].mxu0 %v4177_v31 }
 0x2f7   : > { %v2521_v33 = vadd.f32 %v3732_v32, %v4984_v49  ;;  %v2515_v24 = vpop.f32.mrb[71].mxu1 }
 0x2f8   : > { %v2516_v34 = vadd.f32 %v4984_v49, %v2515_v24 }
 0x2fa   : > { %4182 = vtanh.f32 %v2516_v34 }
 0x2fb   : > { %4184 = vtanh.f32 %v2521_v33 }
 0x2fc   : > { %v4179_v35 = vpop.eup %4178 }
 0x2fd   : > { %v4181_v36 = vpop.eup %4180  ;;  %3855 = vmatprep.mubr.f32.mxu0 %v4179_v35 }
 0x2fe   : > { %v3735_v37 = vpop.f32.mrb[72].mxu1  ;;  %3856 = vmatmul.mubr.f32.gmra.mrb[68].mxu0 %v4181_v36 }
 0x2ff   : > { %v2531_v40 = vadd.f32 %v3735_v37, %v4984_v49  ;;  %v2525_v38 = vpop.f32.mrb[73].mxu1 }
 0x300   : > { %v2526_v41 = vadd.f32 %v4984_v49, %v2525_v38 }
 0x302   : > { %4186 = vtanh.f32 %v2526_v41 }
 0x303   : > { %4188 = vtanh.f32 %v2531_v40 }
 0x304   : > { %v4183_v43 = vpop.eup %4182 }
 0x305   : > { %v4185_v14 = vpop.eup %4184  ;;  %3858 = vmatprep.mubr.f32.mxu0 %v4183_v43 }
 0x306   : > { %v3738_v44 = vpop.f32.mrb[74].mxu1  ;;  %3859 = vmatmul.mubr.f32.gmra.mrb[70].mxu0 %v4185_v14 }
 0x307   : > { %v2541_v45 = vadd.f32 %v3738_v44, %v4984_v49  ;;  %v2535_v47 = vpop.f32.mrb[75].mxu1 }
 0x308   : > { %v2536_v48 = vadd.f32 %v4984_v49, %v2535_v47 }
 0x30a   : > { %4190 = vtanh.f32 %v2536_v48 }
 0x30b   : > { %4192 = vtanh.f32 %v2541_v45  ;;  %v5050_v45 = vld [vmem:[#allocation2] ss:$0 sm:$0xff] }
 0x30c   : > { %v4187_v50 = vpop.eup %4186 }
 0x30d   : > { %v4189_v62 = vpop.eup %4188  ;;  %3861 = vmatprep.mubr.f32.mxu0 %v4187_v50 }
 0x30e   : > { %v3741_v51 = vpop.f32.mrb[76].mxu1  ;;  %3862 = vmatmul.mubr.f32.gmra.mrb[72].mxu0 %v4189_v62 }
 0x30f   : > { %v2551_v52 = vadd.f32 %v3741_v51, %v4984_v49  ;;  %v2545_v53 = vpop.f32.mrb[77].mxu1 }
 0x310   : > { %v2546_v54 = vadd.f32 %v4984_v49, %v2545_v53 }
 0x312   : > { %4194 = vtanh.f32 %v2546_v54 }
 0x313   : > { %4196 = vtanh.f32 %v2551_v52 }
 0x314   : > { %v4191_v55 = vpop.eup %4190 }
 0x315   : > { %v4193_v56 = vpop.eup %4192  ;;  %3864 = vmatprep.mubr.f32.mxu0 %v4191_v55 }
 0x316   : > { %v3744_v57 = vpop.f32.mrb[78].mxu1  ;;  %3865 = vmatmul.mubr.f32.gmra.mrb[74].mxu0 %v4193_v56 }
 0x317   : > { %v2561_v58 = vadd.f32 %v3744_v57, %v4984_v49  ;;  %v2555_v59 = vpop.f32.mrb[79].mxu1 }
 0x318   : > { %v2556_v60 = vadd.f32 %v4984_v49, %v2555_v59 }
 0x31a   : > { %4198 = vtanh.f32 %v2556_v60 }
 0x31b   : > { %4200 = vtanh.f32 %v2561_v58 }
 0x31c   : > { %v4195_v61 = vpop.eup %4194 }
 0x31d   : > { %v4197_v0 = vpop.eup %4196  ;;  %3867 = vmatprep.mubr.f32.mxu0 %v4195_v61 }
 0x31e   : > { %v3747_v1 = vpop.f32.mrb[80].mxu1  ;;  %3868 = vmatmul.mubr.f32.gmra.mrb[76].mxu0 %v4197_v0 }
 0x31f   : > { %v2571_v2 = vadd.f32 %v3747_v1, %v4984_v49  ;;  %v2565_v3 = vpop.f32.mrb[81].mxu1 }
 0x320   : > { %v2566_v4 = vadd.f32 %v4984_v49, %v2565_v3 }
 0x322   : > { %4202 = vtanh.f32 %v2566_v4 }
 0x323   : > { %4204 = vtanh.f32 %v2571_v2 }
 0x324   : > { %v4199_v6 = vpop.eup %4198 }
 0x325   : > { %v4201_v7 = vpop.eup %4200  ;;  %3870 = vmatprep.mubr.f32.mxu0 %v4199_v6 }
 0x326   : > { %v3750_v9 = vpop.f32.mrb[82].mxu1  ;;  %3871 = vmatmul.mubr.f32.gmra.mrb[78].mxu0 %v4201_v7 }
 0x327   : > { %v2581_v10 = vadd.f32 %v3750_v9, %v4984_v49  ;;  %v2575_v8 = vpop.f32.mrb[83].mxu1 }
 0x328   : > { %v2576_v11 = vadd.f32 %v4984_v49, %v2575_v8 }
 0x32a   : > { %4206 = vtanh.f32 %v2576_v11 }
 0x32b   : > { %4208 = vtanh.f32 %v2581_v10 }
 0x32c   : > { %v4203_v12 = vpop.eup %4202 }
 0x32d   : > { %v4205_v13 = vpop.eup %4204  ;;  %3873 = vmatprep.mubr.f32.mxu0 %v4203_v12 }
 0x32e   : > { %v3753_v15 = vpop.f32.mrb[84].mxu1  ;;  %3874 = vmatmul.mubr.f32.gmra.mrb[80].mxu0 %v4205_v13 }
 0x32f   : > { %v2591_v16 = vadd.f32 %v3753_v15, %v4984_v49  ;;  %v2585_v42 = vpop.f32.mrb[85].mxu1 }
 0x330   : > { %v2586_v17 = vadd.f32 %v4984_v49, %v2585_v42 }
 0x332   : > { %4210 = vtanh.f32 %v2586_v17 }
 0x333   : > { %4212 = vtanh.f32 %v2591_v16 }
 0x334   : > { %v4207_v18 = vpop.eup %4206 }
 0x335   : > { %v4209_v19 = vpop.eup %4208  ;;  %3876 = vmatprep.mubr.f32.mxu0 %v4207_v18 }
 0x336   : > { %3877 = vmatmul.mubr.f32.gmra.mrb[82].mxu0 %v4209_v19  ;;  %v3756_v39 = vpop.f32.mrb[86].mxu1 }
 0x337   : > { %v2601_v20 = vadd.f32 %v3756_v39, %v4984_v49  ;;  %v2595_v21 = vpop.f32.mrb[87].mxu1 }
 0x338   : > { %v2596_v5 = vadd.f32 %v4984_v49, %v2595_v21 }
 0x33a   : > { %4214 = vtanh.f32 %v2596_v5 }
 0x33b   : > { %4216 = vtanh.f32 %v2601_v20 }
 0x33c   : > { %v4211_v22 = vpop.eup %4210 }
 0x33d   : > { %v4213_v23 = vpop.eup %4212  ;;  %3879 = vmatprep.mubr.f32.mxu0 %v4211_v22 }
 0x33e   : > { %3880 = vmatmul.mubr.f32.gmra.mrb[84].mxu0 %v4213_v23  ;;  %v3759_v25 = vpop.f32.mrb[88].mxu1 }
 0x33f   : > { %v2611_v26 = vadd.f32 %v3759_v25, %v4984_v49  ;;  %v2605_v27 = vpop.f32.mrb[89].mxu1 }
 0x340   : > { %v2606_v63 = vadd.f32 %v4984_v49, %v2605_v27 }
 0x342   : > { %4218 = vtanh.f32 %v2606_v63 }
 0x343   : > { %4220 = vtanh.f32 %v2611_v26 }
 0x344   : > { %v4215_v46 = vpop.eup %4214 }
 0x345   : > { %v4217_v28 = vpop.eup %4216  ;;  %3882 = vmatprep.mubr.f32.mxu0 %v4215_v46 }
 0x346   : > { %v3762_v29 = vpop.f32.mrb[90].mxu1  ;;  %3883 = vmatmul.mubr.f32.gmra.mrb[86].mxu0 %v4217_v28 }
 0x347   : > { %v2621_v30 = vadd.f32 %v3762_v29, %v4984_v49  ;;  %v2615_v31 = vpop.f32.mrb[91].mxu1 }
 0x348   : > { %v2616_v32 = vadd.f32 %v4984_v49, %v2615_v31 }
 0x34a   : > { %4222 = vtanh.f32 %v2616_v32 }
 0x34b   : > { %4224 = vtanh.f32 %v2621_v30 }
 0x34c   : > { %v4219_v33 = vpop.eup %4218 }
 0x34d   : > { %v4221_v24 = vpop.eup %4220  ;;  %3885 = vmatprep.mubr.f32.mxu0 %v4219_v33 }
 0x34e   : > { %v3765_v34 = vpop.f32.mrb[92].mxu1  ;;  %3886 = vmatmul.mubr.f32.gmra.mrb[88].mxu0 %v4221_v24 }
 0x34f   : > { %v2631_v35 = vadd.f32 %v3765_v34, %v4984_v49  ;;  %v2625_v36 = vpop.f32.mrb[93].mxu1 }
 0x350   : > { %v2626_v37 = vadd.f32 %v4984_v49, %v2625_v36 }
 0x352   : > { %4226 = vtanh.f32 %v2626_v37 }
 0x353   : > { %4228 = vtanh.f32 %v2631_v35 }
 0x354   : > { %v4223_v40 = vpop.eup %4222 }
 0x355   : > { %v4225_v38 = vpop.eup %4224  ;;  %3888 = vmatprep.mubr.f32.mxu0 %v4223_v40 }
 0x356   : > { %v3768_v41 = vpop.f32.mrb[94].mxu1  ;;  %3889 = vmatmul.mubr.f32.gmra.mrb[90].mxu0 %v4225_v38 }
 0x357   : > { %v2641_v43 = vadd.f32 %v3768_v41, %v4984_v49  ;;  %v2635_v14 = vpop.f32.mrb[95].mxu1 }
 0x358   : > { %v2636_v44 = vadd.f32 %v4984_v49, %v2635_v14 }
 0x35a   : > { %4230 = vtanh.f32 %v2636_v44  ;;  %v3803_v47 = vpop.f32.mrb[32].mxu0 }
 0x35b   : > { %4232 = vtanh.f32 %v2641_v43  ;;  %v2803_v48 = vadd.f32 %v3803_v47, %v5050_v45  ;;  %v2797_v50 = vpop.f32.mrb[33].mxu0 }
 0x35c   : > { %v4227_v49 = vpop.eup %4226  ;;  %v2798_v62 = vadd.f32 %v5050_v45, %v2797_v50 }
 0x35d   : > { %v4229_v51 = vpop.eup %4228  ;;  %3118 = vst.msk [vmem:[%s5057_s25 + $0x8] sm:$0xff] %vm3116_vm2, %v2803_v48  ;;  %3891 = vmatprep.mubr.f32.mxu0 %v4227_v49 }
 0x35e   : > { %3117 = vst.msk [vmem:[%s5057_s25] sm:$0xff] %vm3116_vm2, %v2798_v62  ;;  %v3806_v52 = vpop.f32.mrb[34].mxu0  ;;  %3892 = vmatmul.mubr.f32.gmra.mrb[92].mxu0 %v4229_v51 }
 0x35f   : > { %v2813_v53 = vadd.f32 %v3806_v52, %v5050_v45  ;;  %v2807_v54 = vpop.f32.mrb[35].mxu0 }
 0x360   : > { %v2808_v55 = vadd.f32 %v5050_v45, %v2807_v54 }
 0x361   : > { %3120 = vst.msk [vmem:[%s5057_s25 + $0x18] sm:$0xff] %vm3116_vm2, %v2813_v53 }
 0x362   : > { %3119 = vst.msk [vmem:[%s5057_s25 + $0x10] sm:$0xff] %vm3116_vm2, %v2808_v55  ;;  %v3809_v56 = vpop.f32.mrb[36].mxu0 }
 0x363   : > { %v2823_v57 = vadd.f32 %v3809_v56, %v5050_v45  ;;  %v2817_v58 = vpop.f32.mrb[37].mxu0 }
 0x364   : > { %v4231_v59 = vpop.eup %4230  ;;  %v2818_v60 = vadd.f32 %v5050_v45, %v2817_v58 }
 0x365   : > { %v4233_v61 = vpop.eup %4232  ;;  %3122 = vst.msk [vmem:[%s5057_s25 + $0x28] sm:$0xff] %vm3116_vm2, %v2823_v57  ;;  %3894 = vmatprep.mubr.f32.mxu0 %v4231_v59 }
 0x366   : > { %3121 = vst.msk [vmem:[%s5057_s25 + $0x20] sm:$0xff] %vm3116_vm2, %v2818_v60  ;;  %v3812_v0 = vpop.f32.mrb[38].mxu0  ;;  %3895 = vmatmul.mubr.f32.gmra.mrb[94].mxu0 %v4233_v61 }
 0x367   : > { %v2833_v1 = vadd.f32 %v3812_v0, %v5050_v45  ;;  %v2827_v2 = vpop.f32.mrb[39].mxu0 }
 0x368   : > { %v2828_v3 = vadd.f32 %v5050_v45, %v2827_v2 }
 0x369   : > { %3124 = vst.msk [vmem:[%s5057_s25 + $0x38] sm:$0xff] %vm3116_vm2, %v2833_v1 }
 0x36a   : > { %3123 = vst.msk [vmem:[%s5057_s25 + $0x30] sm:$0xff] %vm3116_vm2, %v2828_v3  ;;  %v3815_v4 = vpop.f32.mrb[40].mxu0 }
 0x36b   : > { %v2843_v6 = vadd.f32 %v3815_v4, %v5050_v45  ;;  %v2837_v7 = vpop.f32.mrb[41].mxu0 }
 0x36c   : > { %v2838_v9 = vadd.f32 %v5050_v45, %v2837_v7 }
 0x36d   : > { %3126 = vst.msk [vmem:[%s5057_s25 + $0x48] sm:$0xff] %vm3116_vm2, %v2843_v6 }
 0x36e   : > { %3125 = vst.msk [vmem:[%s5057_s25 + $0x40] sm:$0xff] %vm3116_vm2, %v2838_v9  ;;  %v3818_v10 = vpop.f32.mrb[42].mxu0 }
 0x36f   : > { %v2853_v8 = vadd.f32 %v3818_v10, %v5050_v45  ;;  %v2847_v11 = vpop.f32.mrb[43].mxu0 }
 0x370   : > { %v2848_v12 = vadd.f32 %v5050_v45, %v2847_v11 }
 0x371   : > { %3128 = vst.msk [vmem:[%s5057_s25 + $0x58] sm:$0xff] %vm3116_vm2, %v2853_v8 }
 0x372   : > { %3127 = vst.msk [vmem:[%s5057_s25 + $0x50] sm:$0xff] %vm3116_vm2, %v2848_v12  ;;  %v3821_v13 = vpop.f32.mrb[44].mxu0 }
 0x373   : > { %v2863_v15 = vadd.f32 %v3821_v13, %v5050_v45  ;;  %v2857_v16 = vpop.f32.mrb[45].mxu0 }
 0x374   : > { %v2858_v42 = vadd.f32 %v5050_v45, %v2857_v16 }
 0x375   : > { %3130 = vst.msk [vmem:[%s5057_s25 + $0x68] sm:$0xff] %vm3116_vm2, %v2863_v15 }
 0x376   : > { %3129 = vst.msk [vmem:[%s5057_s25 + $0x60] sm:$0xff] %vm3116_vm2, %v2858_v42 }
 0x379   : > { %v3824_v17 = vpop.f32.mrb[46].mxu0 }
 0x37a   : > { %v2873_v18 = vadd.f32 %v3824_v17, %v5050_v45  ;;  %v2867_v19 = vpop.f32.mrb[47].mxu0 }
 0x37b   : > { %v2868_v39 = vadd.f32 %v5050_v45, %v2867_v19 }
 0x37c   : > { %3132 = vst.msk [vmem:[%s5057_s25 + $0x78] sm:$0xff] %vm3116_vm2, %v2873_v18 }
 0x37d   : > { %3131 = vst.msk [vmem:[%s5057_s25 + $0x70] sm:$0xff] %vm3116_vm2, %v2868_v39 }
 0x381   : > { %v3827_v20 = vpop.f32.mrb[48].mxu0 }
 0x382   : > { %v2883_v21 = vadd.f32 %v3827_v20, %v5050_v45  ;;  %v2877_v5 = vpop.f32.mrb[49].mxu0 }
 0x383   : > { %v2878_v22 = vadd.f32 %v5050_v45, %v2877_v5 }
 0x384   : > { %3134 = vst.msk [vmem:[%s5057_s25 + $0x88] sm:$0xff] %vm3116_vm2, %v2883_v21 }
 0x385   : > { %3133 = vst.msk [vmem:[%s5057_s25 + $0x80] sm:$0xff] %vm3116_vm2, %v2878_v22 }
 0x389   : > { %v3830_v23 = vpop.f32.mrb[50].mxu0 }
 0x38a   : > { %v2893_v25 = vadd.f32 %v3830_v23, %v5050_v45  ;;  %v2887_v26 = vpop.f32.mrb[51].mxu0 }
 0x38b   : > { %v2888_v27 = vadd.f32 %v5050_v45, %v2887_v26 }
 0x38c   : > { %3136 = vst.msk [vmem:[%s5057_s25 + $0x98] sm:$0xff] %vm3116_vm2, %v2893_v25 }
 0x38d   : > { %3135 = vst.msk [vmem:[%s5057_s25 + $0x90] sm:$0xff] %vm3116_vm2, %v2888_v27 }
 0x391   : > { %v3833_v63 = vpop.f32.mrb[52].mxu0 }
 0x392   : > { %v2903_v46 = vadd.f32 %v3833_v63, %v5050_v45  ;;  %v2897_v28 = vpop.f32.mrb[53].mxu0 }
 0x393   : > { %v2898_v29 = vadd.f32 %v5050_v45, %v2897_v28 }
 0x394   : > { %3138 = vst.msk [vmem:[%s5057_s25 + $0xa8] sm:$0xff] %vm3116_vm2, %v2903_v46 }
 0x395   : > { %3137 = vst.msk [vmem:[%s5057_s25 + $0xa0] sm:$0xff] %vm3116_vm2, %v2898_v29 }
 0x399   : > { %v3836_v30 = vpop.f32.mrb[54].mxu0 }
 0x39a   : > { %v2913_v31 = vadd.f32 %v3836_v30, %v5050_v45  ;;  %v2907_v32 = vpop.f32.mrb[55].mxu0 }
 0x39b   : > { %v2908_v33 = vadd.f32 %v5050_v45, %v2907_v32 }
 0x39c   : > { %3140 = vst.msk [vmem:[%s5057_s25 + $0xb8] sm:$0xff] %vm3116_vm2, %v2913_v31 }
 0x39d   : > { %3139 = vst.msk [vmem:[%s5057_s25 + $0xb0] sm:$0xff] %vm3116_vm2, %v2908_v33 }
 0x3a1   : > { %v3839_v24 = vpop.f32.mrb[56].mxu0 }
 0x3a2   : > { %v2923_v34 = vadd.f32 %v3839_v24, %v5050_v45  ;;  %v2917_v35 = vpop.f32.mrb[57].mxu0 }
 0x3a3   : > { %v2918_v36 = vadd.f32 %v5050_v45, %v2917_v35 }
 0x3a4   : > { %3142 = vst.msk [vmem:[%s5057_s25 + $0xc8] sm:$0xff] %vm3116_vm2, %v2923_v34 }
 0x3a5   : > { %3141 = vst.msk [vmem:[%s5057_s25 + $0xc0] sm:$0xff] %vm3116_vm2, %v2918_v36 }
 0x3a9   : > { %v3842_v37 = vpop.f32.mrb[58].mxu0 }
 0x3aa   : > { %v2933_v40 = vadd.f32 %v3842_v37, %v5050_v45  ;;  %v2927_v38 = vpop.f32.mrb[59].mxu0 }
 0x3ab   : > { %v2928_v41 = vadd.f32 %v5050_v45, %v2927_v38 }
 0x3ac   : > { %3144 = vst.msk [vmem:[%s5057_s25 + $0xd8] sm:$0xff] %vm3116_vm2, %v2933_v40 }
 0x3ad   : > { %3143 = vst.msk [vmem:[%s5057_s25 + $0xd0] sm:$0xff] %vm3116_vm2, %v2928_v41 }
 0x3b1   : > { %v3845_v43 = vpop.f32.mrb[60].mxu0 }
 0x3b2   : > { %v2943_v14 = vadd.f32 %v3845_v43, %v5050_v45  ;;  %v2937_v44 = vpop.f32.mrb[61].mxu0 }
 0x3b3   : > { %v2938_v47 = vadd.f32 %v5050_v45, %v2937_v44 }
 0x3b4   : > { %3146 = vst.msk [vmem:[%s5057_s25 + $0xe8] sm:$0xff] %vm3116_vm2, %v2943_v14 }
 0x3b5   : > { %3145 = vst.msk [vmem:[%s5057_s25 + $0xe0] sm:$0xff] %vm3116_vm2, %v2938_v47 }
 0x3b9   : > { %v3848_v48 = vpop.f32.mrb[62].mxu0 }
 0x3ba   : > { %v2953_v50 = vadd.f32 %v3848_v48, %v5050_v45  ;;  %v2947_v49 = vpop.f32.mrb[63].mxu0 }
 0x3bb   : > { %v2948_v62 = vadd.f32 %v5050_v45, %v2947_v49 }
 0x3bc   : > { %3148 = vst.msk [vmem:[%s5057_s25 + $0xf8] sm:$0xff] %vm3116_vm2, %v2953_v50 }
 0x3bd   : > { %3147 = vst.msk [vmem:[%s5057_s25 + $0xf0] sm:$0xff] %vm3116_vm2, %v2948_v62 }
 0x3c1   : > { %v3851_v51 = vpop.f32.mrb[64].mxu0 }
 0x3c2   : > { %v2963_v52 = vadd.f32 %v3851_v51, %v5050_v45  ;;  %v2957_v53 = vpop.f32.mrb[65].mxu0 }
 0x3c3   : > { %v2958_v54 = vadd.f32 %v5050_v45, %v2957_v53 }
 0x3c4   : > { %3150 = vst.msk [vmem:[%s5057_s25 + $0x108] sm:$0xff] %vm3116_vm2, %v2963_v52 }
 0x3c5   : > { %3149 = vst.msk [vmem:[%s5057_s25 + $0x100] sm:$0xff] %vm3116_vm2, %v2958_v54 }
 0x3c9   : > { %v3854_v55 = vpop.f32.mrb[66].mxu0 }
 0x3ca   : > { %v2973_v56 = vadd.f32 %v3854_v55, %v5050_v45  ;;  %v2967_v57 = vpop.f32.mrb[67].mxu0 }
 0x3cb   : > { %v2968_v58 = vadd.f32 %v5050_v45, %v2967_v57 }
 0x3cc   : > { %3152 = vst.msk [vmem:[%s5057_s25 + $0x118] sm:$0xff] %vm3116_vm2, %v2973_v56 }
 0x3cd   : > { %3151 = vst.msk [vmem:[%s5057_s25 + $0x110] sm:$0xff] %vm3116_vm2, %v2968_v58 }
 0x3d1   : > { %v3857_v59 = vpop.f32.mrb[68].mxu0 }
 0x3d2   : > { %v2983_v60 = vadd.f32 %v3857_v59, %v5050_v45  ;;  %v2977_v61 = vpop.f32.mrb[69].mxu0 }
 0x3d3   : > { %v2978_v0 = vadd.f32 %v5050_v45, %v2977_v61 }
 0x3d4   : > { %3154 = vst.msk [vmem:[%s5057_s25 + $0x128] sm:$0xff] %vm3116_vm2, %v2983_v60 }
 0x3d5   : > { %3153 = vst.msk [vmem:[%s5057_s25 + $0x120] sm:$0xff] %vm3116_vm2, %v2978_v0 }
 0x3d9   : > { %v3860_v1 = vpop.f32.mrb[70].mxu0 }
 0x3da   : > { %v2993_v2 = vadd.f32 %v3860_v1, %v5050_v45  ;;  %v2987_v3 = vpop.f32.mrb[71].mxu0 }
 0x3db   : > { %v2988_v4 = vadd.f32 %v5050_v45, %v2987_v3 }
 0x3dc   : > { %3156 = vst.msk [vmem:[%s5057_s25 + $0x138] sm:$0xff] %vm3116_vm2, %v2993_v2 }
 0x3dd   : > { %3155 = vst.msk [vmem:[%s5057_s25 + $0x130] sm:$0xff] %vm3116_vm2, %v2988_v4 }
 0x3e1   : > { %v3863_v6 = vpop.f32.mrb[72].mxu0 }
 0x3e2   : > { %v3003_v7 = vadd.f32 %v3863_v6, %v5050_v45  ;;  %v2997_v9 = vpop.f32.mrb[73].mxu0 }
 0x3e3   : > { %v2998_v10 = vadd.f32 %v5050_v45, %v2997_v9 }
 0x3e4   : > { %3158 = vst.msk [vmem:[%s5057_s25 + $0x148] sm:$0xff] %vm3116_vm2, %v3003_v7 }
 0x3e5   : > { %3157 = vst.msk [vmem:[%s5057_s25 + $0x140] sm:$0xff] %vm3116_vm2, %v2998_v10 }
 0x3e9   : > { %v3866_v8 = vpop.f32.mrb[74].mxu0 }
 0x3ea   : > { %v3013_v11 = vadd.f32 %v3866_v8, %v5050_v45  ;;  %v3007_v12 = vpop.f32.mrb[75].mxu0 }
 0x3eb   : > { %v3008_v13 = vadd.f32 %v5050_v45, %v3007_v12 }
 0x3ec   : > { %3160 = vst.msk [vmem:[%s5057_s25 + $0x158] sm:$0xff] %vm3116_vm2, %v3013_v11 }
 0x3ed   : > { %3159 = vst.msk [vmem:[%s5057_s25 + $0x150] sm:$0xff] %vm3116_vm2, %v3008_v13 }
 0x3f1   : > { %v3869_v15 = vpop.f32.mrb[76].mxu0 }
 0x3f2   : > { %v3023_v16 = vadd.f32 %v3869_v15, %v5050_v45  ;;  %v3017_v42 = vpop.f32.mrb[77].mxu0 }
 0x3f3   : > { %v3018_v17 = vadd.f32 %v5050_v45, %v3017_v42 }
 0x3f4   : > { %3162 = vst.msk [vmem:[%s5057_s25 + $0x168] sm:$0xff] %vm3116_vm2, %v3023_v16 }
 0x3f5   : > { %3161 = vst.msk [vmem:[%s5057_s25 + $0x160] sm:$0xff] %vm3116_vm2, %v3018_v17 }
 0x3f9   : > { %v3872_v18 = vpop.f32.mrb[78].mxu0 }
 0x3fa   : > { %v3033_v19 = vadd.f32 %v3872_v18, %v5050_v45  ;;  %v3027_v39 = vpop.f32.mrb[79].mxu0 }
 0x3fb   : > { %v3028_v20 = vadd.f32 %v5050_v45, %v3027_v39 }
 0x3fc   : > { %3164 = vst.msk [vmem:[%s5057_s25 + $0x178] sm:$0xff] %vm3116_vm2, %v3033_v19 }
 0x3fd   : > { %3163 = vst.msk [vmem:[%s5057_s25 + $0x170] sm:$0xff] %vm3116_vm2, %v3028_v20 }
 0x401   : > { %v3875_v21 = vpop.f32.mrb[80].mxu0 }
 0x402   : > { %v3043_v5 = vadd.f32 %v3875_v21, %v5050_v45  ;;  %v3037_v22 = vpop.f32.mrb[81].mxu0 }
 0x403   : > { %v3038_v23 = vadd.f32 %v5050_v45, %v3037_v22 }
 0x404   : > { %3166 = vst.msk [vmem:[%s5057_s25 + $0x188] sm:$0xff] %vm3116_vm2, %v3043_v5 }
 0x405   : > { %3165 = vst.msk [vmem:[%s5057_s25 + $0x180] sm:$0xff] %vm3116_vm2, %v3038_v23 }
 0x409   : > { %v3878_v25 = vpop.f32.mrb[82].mxu0 }
 0x40a   : > { %v3053_v26 = vadd.f32 %v3878_v25, %v5050_v45  ;;  %v3047_v27 = vpop.f32.mrb[83].mxu0 }
 0x40b   : > { %v3048_v63 = vadd.f32 %v5050_v45, %v3047_v27 }
 0x40c   : > { %3168 = vst.msk [vmem:[%s5057_s25 + $0x198] sm:$0xff] %vm3116_vm2, %v3053_v26 }
 0x40d   : > { %3167 = vst.msk [vmem:[%s5057_s25 + $0x190] sm:$0xff] %vm3116_vm2, %v3048_v63 }
 0x411   : > { %v3881_v46 = vpop.f32.mrb[84].mxu0 }
 0x412   : > { %v3063_v28 = vadd.f32 %v3881_v46, %v5050_v45  ;;  %v3057_v29 = vpop.f32.mrb[85].mxu0 }
 0x413   : > { %v3058_v30 = vadd.f32 %v5050_v45, %v3057_v29 }
 0x414   : > { %3170 = vst.msk [vmem:[%s5057_s25 + $0x1a8] sm:$0xff] %vm3116_vm2, %v3063_v28 }
 0x415   : > { %3169 = vst.msk [vmem:[%s5057_s25 + $0x1a0] sm:$0xff] %vm3116_vm2, %v3058_v30 }
 0x419   : > { %v3884_v31 = vpop.f32.mrb[86].mxu0 }
 0x41a   : > { %v3073_v32 = vadd.f32 %v3884_v31, %v5050_v45  ;;  %v3067_v33 = vpop.f32.mrb[87].mxu0 }
 0x41b   : > { %v3068_v24 = vadd.f32 %v5050_v45, %v3067_v33 }
 0x41c   : > { %3172 = vst.msk [vmem:[%s5057_s25 + $0x1b8] sm:$0xff] %vm3116_vm2, %v3073_v32 }
 0x41d   : > { %3171 = vst.msk [vmem:[%s5057_s25 + $0x1b0] sm:$0xff] %vm3116_vm2, %v3068_v24 }
 0x421   : > { %v3887_v34 = vpop.f32.mrb[88].mxu0 }
 0x422   : > { %v3083_v35 = vadd.f32 %v3887_v34, %v5050_v45  ;;  %v3077_v36 = vpop.f32.mrb[89].mxu0 }
 0x423   : > { %v3078_v37 = vadd.f32 %v5050_v45, %v3077_v36 }
 0x424   : > { %3174 = vst.msk [vmem:[%s5057_s25 + $0x1c8] sm:$0xff] %vm3116_vm2, %v3083_v35 }
 0x425   : > { %3173 = vst.msk [vmem:[%s5057_s25 + $0x1c0] sm:$0xff] %vm3116_vm2, %v3078_v37 }
 0x429   : > { %v3890_v40 = vpop.f32.mrb[90].mxu0 }
 0x42a   : > { %v3093_v38 = vadd.f32 %v3890_v40, %v5050_v45  ;;  %v3087_v41 = vpop.f32.mrb[91].mxu0 }
 0x42b   : > { %v3088_v43 = vadd.f32 %v5050_v45, %v3087_v41 }
 0x42c   : > { %3176 = vst.msk [vmem:[%s5057_s25 + $0x1d8] sm:$0xff] %vm3116_vm2, %v3093_v38 }
 0x42d   : > { %3175 = vst.msk [vmem:[%s5057_s25 + $0x1d0] sm:$0xff] %vm3116_vm2, %v3088_v43 }
 0x431   : > { %v3893_v14 = vpop.f32.mrb[92].mxu0 }
 0x432   : > { %v3103_v44 = vadd.f32 %v3893_v14, %v5050_v45  ;;  %v3097_v47 = vpop.f32.mrb[93].mxu0 }
 0x433   : > { %v3098_v48 = vadd.f32 %v5050_v45, %v3097_v47 }
 0x434   : > { %3178 = vst.msk [vmem:[%s5057_s25 + $0x1e8] sm:$0xff] %vm3116_vm2, %v3103_v44 }
 0x435   : > { %3177 = vst.msk [vmem:[%s5057_s25 + $0x1e0] sm:$0xff] %vm3116_vm2, %v3098_v48 }
 0x439   : > { %v3896_v50 = vpop.f32.mrb[94].mxu0 }
 0x43a   : > { %v3113_v49 = vadd.f32 %v3896_v50, %v5050_v45  ;;  %v3107_v62 = vpop.f32.mrb[95].mxu0 }
 0x43b   : > { %v3108_v51 = vadd.f32 %v5050_v45, %v3107_v62 }
 0x43c   : > { %3180 = vst.msk [vmem:[%s5057_s25 + $0x1f8] sm:$0xff] %vm3116_vm2, %v3113_v49 }
 0x43d   : > { %3179 = vst.msk [vmem:[%s5057_s25 + $0x1f0] sm:$0xff] %vm3116_vm2, %v3108_v51 }
 0x43e PF: > { %s21_s11 = sadd.s32 1, %s4243_s11  }
 0x43f   : > { %p18_p4 = scmp.ge.s32.totalorder %s21_s11, 4  }
 0x441   :  { %20 = sbr.rel (!%p18_p4) target bundleno = 3 (0x3), region = 86 }

</bundles_post_ra>
